<compile_context>
chip_gen: v5e
topology: v5e:2x2
jax: 0.10.0
libtpu: 0.0.40
codegen_flags: <defaults>
</compile_context>

<pallas_src>
import functools

import numpy as np
import jax
import jax.numpy as jnp
from jax.experimental import pallas as pl
from jax.experimental.pallas import tpu as pltpu


# --------------------------------------------------------------------------
# helpers
# --------------------------------------------------------------------------
def _round_up(x, m):
    return ((x + m - 1) // m) * m


def _pad_to(a, axis, target):
    pad = target - a.shape[axis]
    if pad <= 0:
        return a
    widths = [(0, 0)] * a.ndim
    widths[axis] = (0, pad)
    return jnp.pad(a, widths)


# --------------------------------------------------------------------------
# Pallas kernel: sequential GRU recurrence over time chunks.
#   grid = (ndir, num_chunks); direction axis is "parallel" (2 TCs on v7x),
#   chunk axis is "arbitrary" (true recurrence, h carried in VMEM scratch).
# --------------------------------------------------------------------------
def _gru_seq_kernel(gi_ref, whh_ref, bhh_ref, out_ref, h_ref, *,
                    tc, t_real, needs_time_mask):
    d = pl.program_id(0)            # direction: 0 = forward, 1 = backward
    c = pl.program_id(1)            # chunk step within this direction
    nc = pl.num_programs(1)

    @pl.when(c == 0)
    def _():
        h_ref[...] = jnp.zeros_like(h_ref)

    whh = whh_ref[0]                # (Hp, 3Hp)  resident hidden weights
    bhh = bhh_ref[0]                # (1, 3Hp)
    hp = h_ref.shape[1]

    # chunk index along the un-reversed time axis handled by this grid step
    chunk_idx = c + d * (nc - 1 - 2 * c)

    def step(i, h):
        # local time inside the chunk: forward walks 0..tc-1, backward tc-1..0
        lt = i + d * (tc - 1 - 2 * i)

        gi = gi_ref[0, lt]                                         # (Bp, 3Hp)
        gh = jnp.dot(h, whh, preferred_element_type=jnp.float32) + bhh

        r = jax.nn.sigmoid(gi[:, 0:hp] + gh[:, 0:hp])              # reset
        z = jax.nn.sigmoid(gi[:, hp:2 * hp] + gh[:, hp:2 * hp])    # update
        n = jnp.tanh(gi[:, 2 * hp:3 * hp] + r * gh[:, 2 * hp:3 * hp])
        h_new = z * h + (1.0 - z) * n

        if needs_time_mask:
            # freeze state on padded time steps (t >= true sequence length);
            # only reachable when T was rounded up to a multiple of Tc.
            t_glob = chunk_idx * tc + lt
            h_new = jnp.where(t_glob < t_real, h_new, h)

        out_ref[0, lt] = h_new.astype(out_ref.dtype)
        return h_new

    unroll = tc if tc <= 32 else 8
    h_final = jax.lax.fori_loop(0, tc, step, h_ref[...], unroll=unroll)
    h_ref[...] = h_final


# --------------------------------------------------------------------------
# weight preprocessing: transpose + per-gate pad to lane-dense [r|z|n]*Hp
# --------------------------------------------------------------------------
def _prep_direction(w_ih, w_hh, b_ih, b_hh, hidden, hp):
    d_in = w_ih.shape[1]
    h = hidden

    wih_t = jnp.asarray(w_ih, jnp.float32).T.reshape(d_in, 3, h)
    wih_t = _pad_to(wih_t, 2, hp).reshape(d_in, 3 * hp)              # (D, 3Hp)

    whh_t = jnp.asarray(w_hh, jnp.float32).T                          # (H, 3H)
    whh_t = _pad_to(whh_t, 0, hp).reshape(hp, 3, h)
    whh_t = _pad_to(whh_t, 2, hp).reshape(hp, 3 * hp)                 # (Hp, 3Hp)

    bih = _pad_to(jnp.asarray(b_ih, jnp.float32).reshape(3, h), 1, hp).reshape(3 * hp)
    bhh = _pad_to(jnp.asarray(b_hh, jnp.float32).reshape(3, h), 1, hp).reshape(3 * hp)
    return wih_t, whh_t, bih, bhh


# --------------------------------------------------------------------------
# GRU2 forward (bidirectional)
# --------------------------------------------------------------------------
def gru2_forward(x, params, hidden_size, bidirectional=True, time_chunk=None):
    """x: (B, T, D) batch-major, like the PyTorch module."""
    B, T, D = x.shape
    H = hidden_size
    Hp = _round_up(H, 128)                   # lane-dense gate / output width
    Bp = _round_up(B, 8)                     # sublane-dense batch
    if time_chunk is None:
        time_chunk = min(128, _round_up(T, 8))
    Tc = int(time_chunk)
    nc = pl.cdiv(T, Tc)
    T_pad = nc * Tc

    dir_names = ("fw", "bw") if bidirectional else ("fw",)
    ndir = len(dir_names)

    prepped = [_prep_direction(*params[name], H, Hp) for name in dir_names]
    wih_stack = jnp.stack([p[0] for p in prepped])                   # (ndir, D, 3Hp)
    whh_stack = jnp.stack([p[1] for p in prepped])                   # (ndir, Hp, 3Hp)
    bih_stack = jnp.stack([p[2] for p in prepped])                   # (ndir, 3Hp)
    bhh_stack = jnp.stack([p[3] for p in prepped]).reshape(ndir, 1, 3 * Hp)

    # time-major, padded activations
    x_tbd = jnp.transpose(x, (1, 0, 2)).astype(jnp.float32)          # (T, B, D)
    x_tbd = _pad_to(_pad_to(x_tbd, 1, Bp), 0, T_pad)                 # (T_pad, Bp, D)

    # Hoisted input projection: one big batched matmul off the recurrent
    # critical path (T_pad*Bp rows on the MXU instead of B rows per step).
    # TODO(synk): for v6e/v7x, cast wih_stack / gi to bf16 for MXU peak; kept
    # f32 here so the in-script 1e-5 correctness check stays tight.
    gi = jnp.einsum("tbd,gdh->gtbh", x_tbd, wih_stack,
                    precision=jax.lax.Precision.HIGHEST)
    gi = gi + bih_stack[:, None, None, :]                            # (ndir, T_pad, Bp, 3Hp)

    kernel = functools.partial(_gru_seq_kernel, tc=Tc, t_real=T,
                               needs_time_mask=(T_pad != T))

    # forward (d=0): chunk c; backward (d=1): chunk nc-1-c (reversal lives in
    # the index_map — no x[::-1] / out[::-1] materialization).
    def time_map(d, c):
        return (d, c + d * (nc - 1 - 2 * c), 0, 0)

    out = pl.pallas_call(
        kernel,
        out_shape=jax.ShapeDtypeStruct((ndir, T_pad, Bp, Hp), jnp.float32),
        grid_spec=pltpu.PrefetchScalarGridSpec(
            num_scalar_prefetch=0,
            grid=(ndir, nc),
            in_specs=[
                pl.BlockSpec((1, Tc, Bp, 3 * Hp), time_map),              # gi chunk
                pl.BlockSpec((1, Hp, 3 * Hp), lambda d, c: (d, 0, 0)),    # W_hh^T
                pl.BlockSpec((1, 1, 3 * Hp), lambda d, c: (d, 0, 0)),     # b_hh
            ],
            out_specs=pl.BlockSpec((1, Tc, Bp, Hp), time_map),            # hidden states
            scratch_shapes=[pltpu.VMEM((Bp, Hp), jnp.float32)],           # recurrent h
        ),
        compiler_params=pltpu.CompilerParams(
            dimension_semantics=("parallel", "arbitrary"),   # dir axis -> 2 TCs on v7x
            vmem_limit_bytes=32 * 1024 * 1024,
        ),
    )(gi, whh_stack, bhh_stack)

    out_fw = jnp.transpose(out[0, :T, :B, :H], (1, 0, 2))            # (B, T, H)
    h_fw = out[0, T - 1, :B, :H]
    if not bidirectional:
        return out_fw, h_fw
    out_bw = jnp.transpose(out[1, :T, :B, :H], (1, 0, 2))            # (B, T, H)
    h_bw = out[1, 0, :B, :H]
    outputs = jnp.concatenate([out_fw, out_bw], axis=-1)             # (B, T, 2H)
    return outputs, h_fw, h_bw


# --------------------------------------------------------------------------
# Pure-JAX reference (mirrors the PyTorch code) for correctness checking
# --------------------------------------------------------------------------
def _cell_ref(x_t, h, w_ih, w_hh, b_ih, b_hh):
    H = h.shape[1]
    gi = jnp.dot(x_t, w_ih.T, precision=jax.lax.Precision.HIGHEST) + b_ih
    gh = jnp.dot(h, w_hh.T, precision=jax.lax.Precision.HIGHEST) + b_hh
    r = jax.nn.sigmoid(gi[:, :H] + gh[:, :H])
    z = jax.nn.sigmoid(gi[:, H:2 * H] + gh[:, H:2 * H])
    n = jnp.tanh(gi[:, 2 * H:] + r * gh[:, 2 * H:])
    return z * h + (1.0 - z) * n


def gru2_ref(x, params, hidden_size):
    B, T, _ = x.shape
    h_fw = jnp.zeros((B, hidden_size), jnp.float32)
    outs_fw = []
    for t in range(T):
        h_fw = _cell_ref(x[:, t], h_fw, *params["fw"])
        outs_fw.append(h_fw)
    out_fw = jnp.stack(outs_fw, axis=1)
    h_bw = jnp.zeros((B, hidden_size), jnp.float32)
    outs_bw = [None] * T
    for t in reversed(range(T)):
        h_bw = _cell_ref(x[:, t], h_bw, *params["bw"])
        outs_bw[t] = h_bw
    out_bw = jnp.stack(outs_bw, axis=1)
    return jnp.concatenate([out_fw, out_bw], axis=-1), h_fw, h_bw


# --------------------------------------------------------------------------
# Deterministic parameter init (matches GRUCellV2 shapes / uniform(-K, K))
# --------------------------------------------------------------------------
def init_cell_params(key, input_size, hidden_size):
    K = 1.0 / float(np.sqrt(hidden_size))
    k1, k2, k3, k4 = jax.random.split(key, 4)
    w_ih = jax.random.uniform(k1, (3 * hidden_size, input_size), jnp.float32, -K, K)
    w_hh = jax.random.uniform(k2, (3 * hidden_size, hidden_size), jnp.float32, -K, K)
    b_ih = jax.random.uniform(k3, (3 * hidden_size,), jnp.float32, -K, K)
    b_hh = jax.random.uniform(k4, (3 * hidden_size,), jnp.float32, -K, K)
    return (w_ih, w_hh, b_ih, b_hh)


if __name__ == "__main__":
    B, T, D, H = 2, 8, 16, 32

    root = jax.random.PRNGKey(0)
    kx, kfw, kbw = jax.random.split(root, 3)
    x = jax.random.normal(kx, (B, T, D), jnp.float32)

    params = {
        "fw": init_cell_params(kfw, D, H),
        "bw": init_cell_params(kbw, D, H),
    }

    outputs, h_fw, h_bw = gru2_forward(x, params, H, bidirectional=True)
    jax.block_until_ready((outputs, h_fw, h_bw))

    # correctness check against a plain-JAX reference of the PyTorch forward
    out_ref, h_fw_ref, h_bw_ref = gru2_ref(x, params, H)
    np.testing.assert_allclose(np.asarray(outputs), np.asarray(out_ref), rtol=1e-5, atol=1e-5)
    np.testing.assert_allclose(np.asarray(h_fw), np.asarray(h_fw_ref), rtol=1e-5, atol=1e-5)
    np.testing.assert_allclose(np.asarray(h_bw), np.asarray(h_bw_ref), rtol=1e-5, atol=1e-5)

    assert outputs.shape == (B, T, 2 * H) and h_fw.shape == (B, H) and h_bw.shape == (B, H)
    print("KERNEL_OK")
</pallas_src>

<mosaic_0001>
module attributes {stable_mosaic.version = 11 : i64} {
  func.func @_gru_seq_kernel(%arg0: i32, %arg1: i32, %arg2: memref<1x8x8x384xf32, #tpu.memory_space<vmem>>, %arg3: memref<1x128x384xf32, #tpu.memory_space<vmem>>, %arg4: memref<1x1x384xf32, #tpu.memory_space<vmem>>, %arg5: memref<1x8x8x128xf32, #tpu.memory_space<vmem>>, %arg6: memref<8x128xf32, #tpu.memory_space<vmem>>) attributes {dimension_semantics = [#tpu.dimension_semantics<parallel>, #tpu.dimension_semantics<arbitrary>], iteration_bounds = array<i64: 2, 1>, scalar_prefetch = 0 : i64, scratch_operands = 1 : i64, tpu.core_type = #tpu.core_type<tc>, window_params = [{transform_indices = @transform_0, window_bounds = array<i64: 1, 8, 8, 384>}, {transform_indices = @transform_1, window_bounds = array<i64: 1, 128, 384>}, {transform_indices = @transform_2, window_bounds = array<i64: 1, 1, 384>}, {transform_indices = @transform_3, window_bounds = array<i64: 1, 8, 8, 128>}]} {
    %c0_i32 = arith.constant 0 : i32
    %0 = arith.cmpi eq, %arg1, %c0_i32 : i32
    %1 = arith.extui %0 : i1 to i32
    %c0_i32_0 = arith.constant 0 : i32
    %2 = arith.cmpi ne, %1, %c0_i32_0 : i32
    scf.if %2 {
      %cst_106 = arith.constant 0.000000e+00 : f32
      %329 = vector.broadcast %cst_106 : f32 to vector<8x128xf32>
      %c0_107 = arith.constant 0 : index
      %c0_108 = arith.constant 0 : index
      %330 = vector.load %arg6[%c0_107, %c0_108] : memref<8x128xf32, #tpu.memory_space<vmem>>, vector<8x128xf32>
      tpu.vector_store %arg6[%c0_107, %c0_108], %329 {strides = array<i32>} : memref<8x128xf32, #tpu.memory_space<vmem>>, vector<8x128xf32>,
    } else {
    }
    %c0 = arith.constant 0 : index
    %c0_1 = arith.constant 0 : index
    %c0_2 = arith.constant 0 : index
    %3 = vector.load %arg3[%c0, %c0_1, %c0_2] : memref<1x128x384xf32, #tpu.memory_space<vmem>>, vector<1x128x384xf32>
    %4 = vector.shape_cast %3 : vector<1x128x384xf32> to vector<128x384xf32>
    %c0_3 = arith.constant 0 : index
    %c0_4 = arith.constant 0 : index
    %c0_5 = arith.constant 0 : index
    %5 = vector.load %arg4[%c0_3, %c0_4, %c0_5] : memref<1x1x384xf32, #tpu.memory_space<vmem>>, vector<1x1x384xf32>
    %6 = vector.shape_cast %5 : vector<1x1x384xf32> to vector<1x384xf32>
    %c0_6 = arith.constant 0 : index
    %c0_7 = arith.constant 0 : index
    %7 = vector.load %arg6[%c0_6, %c0_7] : memref<8x128xf32, #tpu.memory_space<vmem>>, vector<8x128xf32>
    %c0_i32_8 = arith.constant 0 : i32
    %c2_i32 = arith.constant 2 : i32
    %8 = arith.muli %c2_i32, %c0_i32_8 : i32
    %c7_i32 = arith.constant 7 : i32
    %9 = arith.subi %c7_i32, %8 : i32
    %10 = arith.muli %arg0, %9 : i32
    %11 = arith.addi %c0_i32_8, %10 : i32
    %c0_9 = arith.constant 0 : index
    %12 = arith.index_cast %11 : i32 to index
    %c0_10 = arith.constant 0 : index
    %c0_11 = arith.constant 0 : index
    %13 = vector.load %arg2[%c0_9, %12, %c0_10, %c0_11] : memref<1x8x8x384xf32, #tpu.memory_space<vmem>>, vector<1x1x8x384xf32>
    %14 = vector.shape_cast %13 : vector<1x1x8x384xf32> to vector<8x384xf32>
    %cst = arith.constant dense<0.000000e+00> : vector<8x384xf32>
    %15 = tpu.matmul %7, %4, %cst {dimension_numbers = #tpu.dot_dimension_numbers<[1], [0], [0], [1], [0, 0, 1, 1], [], []>} : vector<8x128xf32>, vector<128x384xf32>, vector<8x384xf32> -> vector<8x384xf32>
    %16 = vector.broadcast %6 : vector<1x384xf32> to vector<8x384xf32>
    %17 = arith.addf %15, %16 : vector<8x384xf32>
    %18 = vector.extract_strided_slice %14 {offsets = [0, 0], sizes = [8, 128], strides = [1, 1]} : vector<8x384xf32> to vector<8x128xf32>
    %19 = vector.extract_strided_slice %17 {offsets = [0, 0], sizes = [8, 128], strides = [1, 1]} : vector<8x384xf32> to vector<8x128xf32>
    %20 = arith.addf %18, %19 : vector<8x128xf32>
    %21 = arith.negf %20 : vector<8x128xf32>
    %22 = math.exp %21 : vector<8x128xf32>
    %cst_12 = arith.constant 1.000000e+00 : f32
    %23 = vector.broadcast %cst_12 : f32 to vector<8x128xf32>
    %24 = arith.addf %23, %22 : vector<8x128xf32>
    %25 = arith.divf %23, %24 : vector<8x128xf32>
    %26 = vector.extract_strided_slice %14 {offsets = [0, 128], sizes = [8, 128], strides = [1, 1]} : vector<8x384xf32> to vector<8x128xf32>
    %27 = vector.extract_strided_slice %17 {offsets = [0, 128], sizes = [8, 128], strides = [1, 1]} : vector<8x384xf32> to vector<8x128xf32>
    %28 = arith.addf %26, %27 : vector<8x128xf32>
    %29 = arith.negf %28 : vector<8x128xf32>
    %30 = math.exp %29 : vector<8x128xf32>
    %cst_13 = arith.constant 1.000000e+00 : f32
    %31 = vector.broadcast %cst_13 : f32 to vector<8x128xf32>
    %32 = arith.addf %31, %30 : vector<8x128xf32>
    %33 = arith.divf %31, %32 : vector<8x128xf32>
    %34 = vector.extract_strided_slice %14 {offsets = [0, 256], sizes = [8, 128], strides = [1, 1]} : vector<8x384xf32> to vector<8x128xf32>
    %35 = vector.extract_strided_slice %17 {offsets = [0, 256], sizes = [8, 128], strides = [1, 1]} : vector<8x384xf32> to vector<8x128xf32>
    %36 = arith.mulf %25, %35 : vector<8x128xf32>
    %37 = arith.addf %34, %36 : vector<8x128xf32>
    %38 = math.tanh %37 : vector<8x128xf32>
    %39 = arith.mulf %33, %7 : vector<8x128xf32>
    %cst_14 = arith.constant 1.000000e+00 : f32
    %40 = vector.broadcast %cst_14 : f32 to vector<8x128xf32>
    %41 = arith.subf %40, %33 : vector<8x128xf32>
    %42 = arith.mulf %41, %38 : vector<8x128xf32>
    %43 = arith.addf %39, %42 : vector<8x128xf32>
    %c0_15 = arith.constant 0 : index
    %44 = arith.index_cast %11 : i32 to index
    %c0_16 = arith.constant 0 : index
    %c0_17 = arith.constant 0 : index
    %45 = vector.load %arg5[%c0_15, %44, %c0_16, %c0_17] : memref<1x8x8x128xf32, #tpu.memory_space<vmem>>, vector<1x1x8x128xf32>
    %46 = vector.shape_cast %45 : vector<1x1x8x128xf32> to vector<8x128xf32>
    %47 = vector.shape_cast %43 : vector<8x128xf32> to vector<1x1x8x128xf32>
    tpu.vector_store %arg5[%c0_15, %44, %c0_16, %c0_17], %47 {strides = array<i32>} : memref<1x8x8x128xf32, #tpu.memory_space<vmem>>, vector<1x1x8x128xf32>,
    %c1_i32 = arith.constant 1 : i32
    %c2_i32_18 = arith.constant 2 : i32
    %48 = arith.muli %c2_i32_18, %c1_i32 : i32
    %c7_i32_19 = arith.constant 7 : i32
    %49 = arith.subi %c7_i32_19, %48 : i32
    %50 = arith.muli %arg0, %49 : i32
    %51 = arith.addi %c1_i32, %50 : i32
    %c0_20 = arith.constant 0 : index
    %52 = arith.index_cast %51 : i32 to index
    %c0_21 = arith.constant 0 : index
    %c0_22 = arith.constant 0 : index
    %53 = vector.load %arg2[%c0_20, %52, %c0_21, %c0_22] : memref<1x8x8x384xf32, #tpu.memory_space<vmem>>, vector<1x1x8x384xf32>
    %54 = vector.shape_cast %53 : vector<1x1x8x384xf32> to vector<8x384xf32>
    %cst_23 = arith.constant dense<0.000000e+00> : vector<8x384xf32>
    %55 = tpu.matmul %43, %4, %cst_23 {dimension_numbers = #tpu.dot_dimension_numbers<[1], [0], [0], [1], [0, 0, 1, 1], [], []>} : vector<8x128xf32>, vector<128x384xf32>, vector<8x384xf32> -> vector<8x384xf32>
    %56 = vector.broadcast %6 : vector<1x384xf32> to vector<8x384xf32>
    %57 = arith.addf %55, %56 : vector<8x384xf32>
    %58 = vector.extract_strided_slice %54 {offsets = [0, 0], sizes = [8, 128], strides = [1, 1]} : vector<8x384xf32> to vector<8x128xf32>
    %59 = vector.extract_strided_slice %57 {offsets = [0, 0], sizes = [8, 128], strides = [1, 1]} : vector<8x384xf32> to vector<8x128xf32>
    %60 = arith.addf %58, %59 : vector<8x128xf32>
    %61 = arith.negf %60 : vector<8x128xf32>
    %62 = math.exp %61 : vector<8x128xf32>
    %cst_24 = arith.constant 1.000000e+00 : f32
    %63 = vector.broadcast %cst_24 : f32 to vector<8x128xf32>
    %64 = arith.addf %63, %62 : vector<8x128xf32>
    %65 = arith.divf %63, %64 : vector<8x128xf32>
    %66 = vector.extract_strided_slice %54 {offsets = [0, 128], sizes = [8, 128], strides = [1, 1]} : vector<8x384xf32> to vector<8x128xf32>
    %67 = vector.extract_strided_slice %57 {offsets = [0, 128], sizes = [8, 128], strides = [1, 1]} : vector<8x384xf32> to vector<8x128xf32>
    %68 = arith.addf %66, %67 : vector<8x128xf32>
    %69 = arith.negf %68 : vector<8x128xf32>
    %70 = math.exp %69 : vector<8x128xf32>
    %cst_25 = arith.constant 1.000000e+00 : f32
    %71 = vector.broadcast %cst_25 : f32 to vector<8x128xf32>
    %72 = arith.addf %71, %70 : vector<8x128xf32>
    %73 = arith.divf %71, %72 : vector<8x128xf32>
    %74 = vector.extract_strided_slice %54 {offsets = [0, 256], sizes = [8, 128], strides = [1, 1]} : vector<8x384xf32> to vector<8x128xf32>
    %75 = vector.extract_strided_slice %57 {offsets = [0, 256], sizes = [8, 128], strides = [1, 1]} : vector<8x384xf32> to vector<8x128xf32>
    %76 = arith.mulf %65, %75 : vector<8x128xf32>
    %77 = arith.addf %74, %76 : vector<8x128xf32>
    %78 = math.tanh %77 : vector<8x128xf32>
    %79 = arith.mulf %73, %43 : vector<8x128xf32>
    %cst_26 = arith.constant 1.000000e+00 : f32
    %80 = vector.broadcast %cst_26 : f32 to vector<8x128xf32>
    %81 = arith.subf %80, %73 : vector<8x128xf32>
    %82 = arith.mulf %81, %78 : vector<8x128xf32>
    %83 = arith.addf %79, %82 : vector<8x128xf32>
    %c0_27 = arith.constant 0 : index
    %84 = arith.index_cast %51 : i32 to index
    %c0_28 = arith.constant 0 : index
    %c0_29 = arith.constant 0 : index
    %85 = vector.load %arg5[%c0_27, %84, %c0_28, %c0_29] : memref<1x8x8x128xf32, #tpu.memory_space<vmem>>, vector<1x1x8x128xf32>
    %86 = vector.shape_cast %85 : vector<1x1x8x128xf32> to vector<8x128xf32>
    %87 = vector.shape_cast %83 : vector<8x128xf32> to vector<1x1x8x128xf32>
    tpu.vector_store %arg5[%c0_27, %84, %c0_28, %c0_29], %87 {strides = array<i32>} : memref<1x8x8x128xf32, #tpu.memory_space<vmem>>, vector<1x1x8x128xf32>,
    %c2_i32_30 = arith.constant 2 : i32
    %c2_i32_31 = arith.constant 2 : i32
    %88 = arith.muli %c2_i32_31, %c2_i32_30 : i32
    %c7_i32_32 = arith.constant 7 : i32
    %89 = arith.subi %c7_i32_32, %88 : i32
    %90 = arith.muli %arg0, %89 : i32
    %91 = arith.addi %c2_i32_30, %90 : i32
    %c0_33 = arith.constant 0 : index
    %92 = arith.index_cast %91 : i32 to index
    %c0_34 = arith.constant 0 : index
    %c0_35 = arith.constant 0 : index
    %93 = vector.load %arg2[%c0_33, %92, %c0_34, %c0_35] : memref<1x8x8x384xf32, #tpu.memory_space<vmem>>, vector<1x1x8x384xf32>
    %94 = vector.shape_cast %93 : vector<1x1x8x384xf32> to vector<8x384xf32>
    %cst_36 = arith.constant dense<0.000000e+00> : vector<8x384xf32>
    %95 = tpu.matmul %83, %4, %cst_36 {dimension_numbers = #tpu.dot_dimension_numbers<[1], [0], [0], [1], [0, 0, 1, 1], [], []>} : vector<8x128xf32>, vector<128x384xf32>, vector<8x384xf32> -> vector<8x384xf32>
    %96 = vector.broadcast %6 : vector<1x384xf32> to vector<8x384xf32>
    %97 = arith.addf %95, %96 : vector<8x384xf32>
    %98 = vector.extract_strided_slice %94 {offsets = [0, 0], sizes = [8, 128], strides = [1, 1]} : vector<8x384xf32> to vector<8x128xf32>
    %99 = vector.extract_strided_slice %97 {offsets = [0, 0], sizes = [8, 128], strides = [1, 1]} : vector<8x384xf32> to vector<8x128xf32>
    %100 = arith.addf %98, %99 : vector<8x128xf32>
    %101 = arith.negf %100 : vector<8x128xf32>
    %102 = math.exp %101 : vector<8x128xf32>
    %cst_37 = arith.constant 1.000000e+00 : f32
    %103 = vector.broadcast %cst_37 : f32 to vector<8x128xf32>
    %104 = arith.addf %103, %102 : vector<8x128xf32>
    %105 = arith.divf %103, %104 : vector<8x128xf32>
    %106 = vector.extract_strided_slice %94 {offsets = [0, 128], sizes = [8, 128], strides = [1, 1]} : vector<8x384xf32> to vector<8x128xf32>
    %107 = vector.extract_strided_slice %97 {offsets = [0, 128], sizes = [8, 128], strides = [1, 1]} : vector<8x384xf32> to vector<8x128xf32>
    %108 = arith.addf %106, %107 : vector<8x128xf32>
    %109 = arith.negf %108 : vector<8x128xf32>
    %110 = math.exp %109 : vector<8x128xf32>
    %cst_38 = arith.constant 1.000000e+00 : f32
    %111 = vector.broadcast %cst_38 : f32 to vector<8x128xf32>
    %112 = arith.addf %111, %110 : vector<8x128xf32>
    %113 = arith.divf %111, %112 : vector<8x128xf32>
    %114 = vector.extract_strided_slice %94 {offsets = [0, 256], sizes = [8, 128], strides = [1, 1]} : vector<8x384xf32> to vector<8x128xf32>
    %115 = vector.extract_strided_slice %97 {offsets = [0, 256], sizes = [8, 128], strides = [1, 1]} : vector<8x384xf32> to vector<8x128xf32>
    %116 = arith.mulf %105, %115 : vector<8x128xf32>
    %117 = arith.addf %114, %116 : vector<8x128xf32>
    %118 = math.tanh %117 : vector<8x128xf32>
    %119 = arith.mulf %113, %83 : vector<8x128xf32>
    %cst_39 = arith.constant 1.000000e+00 : f32
    %120 = vector.broadcast %cst_39 : f32 to vector<8x128xf32>
    %121 = arith.subf %120, %113 : vector<8x128xf32>
    %122 = arith.mulf %121, %118 : vector<8x128xf32>
    %123 = arith.addf %119, %122 : vector<8x128xf32>
    %c0_40 = arith.constant 0 : index
    %124 = arith.index_cast %91 : i32 to index
    %c0_41 = arith.constant 0 : index
    %c0_42 = arith.constant 0 : index
    %125 = vector.load %arg5[%c0_40, %124, %c0_41, %c0_42] : memref<1x8x8x128xf32, #tpu.memory_space<vmem>>, vector<1x1x8x128xf32>
    %126 = vector.shape_cast %125 : vector<1x1x8x128xf32> to vector<8x128xf32>
    %127 = vector.shape_cast %123 : vector<8x128xf32> to vector<1x1x8x128xf32>
    tpu.vector_store %arg5[%c0_40, %124, %c0_41, %c0_42], %127 {strides = array<i32>} : memref<1x8x8x128xf32, #tpu.memory_space<vmem>>, vector<1x1x8x128xf32>,
    %c3_i32 = arith.constant 3 : i32
    %c2_i32_43 = arith.constant 2 : i32
    %128 = arith.muli %c2_i32_43, %c3_i32 : i32
    %c7_i32_44 = arith.constant 7 : i32
    %129 = arith.subi %c7_i32_44, %128 : i32
    %130 = arith.muli %arg0, %129 : i32
    %131 = arith.addi %c3_i32, %130 : i32
    %c0_45 = arith.constant 0 : index
    %132 = arith.index_cast %131 : i32 to index
    %c0_46 = arith.constant 0 : index
    %c0_47 = arith.constant 0 : index
    %133 = vector.load %arg2[%c0_45, %132, %c0_46, %c0_47] : memref<1x8x8x384xf32, #tpu.memory_space<vmem>>, vector<1x1x8x384xf32>
    %134 = vector.shape_cast %133 : vector<1x1x8x384xf32> to vector<8x384xf32>
    %cst_48 = arith.constant dense<0.000000e+00> : vector<8x384xf32>
    %135 = tpu.matmul %123, %4, %cst_48 {dimension_numbers = #tpu.dot_dimension_numbers<[1], [0], [0], [1], [0, 0, 1, 1], [], []>} : vector<8x128xf32>, vector<128x384xf32>, vector<8x384xf32> -> vector<8x384xf32>
    %136 = vector.broadcast %6 : vector<1x384xf32> to vector<8x384xf32>
    %137 = arith.addf %135, %136 : vector<8x384xf32>
    %138 = vector.extract_strided_slice %134 {offsets = [0, 0], sizes = [8, 128], strides = [1, 1]} : vector<8x384xf32> to vector<8x128xf32>
    %139 = vector.extract_strided_slice %137 {offsets = [0, 0], sizes = [8, 128], strides = [1, 1]} : vector<8x384xf32> to vector<8x128xf32>
    %140 = arith.addf %138, %139 : vector<8x128xf32>
    %141 = arith.negf %140 : vector<8x128xf32>
    %142 = math.exp %141 : vector<8x128xf32>
    %cst_49 = arith.constant 1.000000e+00 : f32
    %143 = vector.broadcast %cst_49 : f32 to vector<8x128xf32>
    %144 = arith.addf %143, %142 : vector<8x128xf32>
    %145 = arith.divf %143, %144 : vector<8x128xf32>
    %146 = vector.extract_strided_slice %134 {offsets = [0, 128], sizes = [8, 128], strides = [1, 1]} : vector<8x384xf32> to vector<8x128xf32>
    %147 = vector.extract_strided_slice %137 {offsets = [0, 128], sizes = [8, 128], strides = [1, 1]} : vector<8x384xf32> to vector<8x128xf32>
    %148 = arith.addf %146, %147 : vector<8x128xf32>
    %149 = arith.negf %148 : vector<8x128xf32>
    %150 = math.exp %149 : vector<8x128xf32>
    %cst_50 = arith.constant 1.000000e+00 : f32
    %151 = vector.broadcast %cst_50 : f32 to vector<8x128xf32>
    %152 = arith.addf %151, %150 : vector<8x128xf32>
    %153 = arith.divf %151, %152 : vector<8x128xf32>
    %154 = vector.extract_strided_slice %134 {offsets = [0, 256], sizes = [8, 128], strides = [1, 1]} : vector<8x384xf32> to vector<8x128xf32>
    %155 = vector.extract_strided_slice %137 {offsets = [0, 256], sizes = [8, 128], strides = [1, 1]} : vector<8x384xf32> to vector<8x128xf32>
    %156 = arith.mulf %145, %155 : vector<8x128xf32>
    %157 = arith.addf %154, %156 : vector<8x128xf32>
    %158 = math.tanh %157 : vector<8x128xf32>
    %159 = arith.mulf %153, %123 : vector<8x128xf32>
    %cst_51 = arith.constant 1.000000e+00 : f32
    %160 = vector.broadcast %cst_51 : f32 to vector<8x128xf32>
    %161 = arith.subf %160, %153 : vector<8x128xf32>
    %162 = arith.mulf %161, %158 : vector<8x128xf32>
    %163 = arith.addf %159, %162 : vector<8x128xf32>
    %c0_52 = arith.constant 0 : index
    %164 = arith.index_cast %131 : i32 to index
    %c0_53 = arith.constant 0 : index
    %c0_54 = arith.constant 0 : index
    %165 = vector.load %arg5[%c0_52, %164, %c0_53, %c0_54] : memref<1x8x8x128xf32, #tpu.memory_space<vmem>>, vector<1x1x8x128xf32>
    %166 = vector.shape_cast %165 : vector<1x1x8x128xf32> to vector<8x128xf32>
    %167 = vector.shape_cast %163 : vector<8x128xf32> to vector<1x1x8x128xf32>
    tpu.vector_store %arg5[%c0_52, %164, %c0_53, %c0_54], %167 {strides = array<i32>} : memref<1x8x8x128xf32, #tpu.memory_space<vmem>>, vector<1x1x8x128xf32>,
    %c4_i32 = arith.constant 4 : i32
    %c2_i32_55 = arith.constant 2 : i32
    %168 = arith.muli %c2_i32_55, %c4_i32 : i32
    %c7_i32_56 = arith.constant 7 : i32
    %169 = arith.subi %c7_i32_56, %168 : i32
    %170 = arith.muli %arg0, %169 : i32
    %171 = arith.addi %c4_i32, %170 : i32
    %c0_57 = arith.constant 0 : index
    %172 = arith.index_cast %171 : i32 to index
    %c0_58 = arith.constant 0 : index
    %c0_59 = arith.constant 0 : index
    %173 = vector.load %arg2[%c0_57, %172, %c0_58, %c0_59] : memref<1x8x8x384xf32, #tpu.memory_space<vmem>>, vector<1x1x8x384xf32>
    %174 = vector.shape_cast %173 : vector<1x1x8x384xf32> to vector<8x384xf32>
    %cst_60 = arith.constant dense<0.000000e+00> : vector<8x384xf32>
    %175 = tpu.matmul %163, %4, %cst_60 {dimension_numbers = #tpu.dot_dimension_numbers<[1], [0], [0], [1], [0, 0, 1, 1], [], []>} : vector<8x128xf32>, vector<128x384xf32>, vector<8x384xf32> -> vector<8x384xf32>
    %176 = vector.broadcast %6 : vector<1x384xf32> to vector<8x384xf32>
    %177 = arith.addf %175, %176 : vector<8x384xf32>
    %178 = vector.extract_strided_slice %174 {offsets = [0, 0], sizes = [8, 128], strides = [1, 1]} : vector<8x384xf32> to vector<8x128xf32>
    %179 = vector.extract_strided_slice %177 {offsets = [0, 0], sizes = [8, 128], strides = [1, 1]} : vector<8x384xf32> to vector<8x128xf32>
    %180 = arith.addf %178, %179 : vector<8x128xf32>
    %181 = arith.negf %180 : vector<8x128xf32>
    %182 = math.exp %181 : vector<8x128xf32>
    %cst_61 = arith.constant 1.000000e+00 : f32
    %183 = vector.broadcast %cst_61 : f32 to vector<8x128xf32>
    %184 = arith.addf %183, %182 : vector<8x128xf32>
    %185 = arith.divf %183, %184 : vector<8x128xf32>
    %186 = vector.extract_strided_slice %174 {offsets = [0, 128], sizes = [8, 128], strides = [1, 1]} : vector<8x384xf32> to vector<8x128xf32>
    %187 = vector.extract_strided_slice %177 {offsets = [0, 128], sizes = [8, 128], strides = [1, 1]} : vector<8x384xf32> to vector<8x128xf32>
    %188 = arith.addf %186, %187 : vector<8x128xf32>
    %189 = arith.negf %188 : vector<8x128xf32>
    %190 = math.exp %189 : vector<8x128xf32>
    %cst_62 = arith.constant 1.000000e+00 : f32
    %191 = vector.broadcast %cst_62 : f32 to vector<8x128xf32>
    %192 = arith.addf %191, %190 : vector<8x128xf32>
    %193 = arith.divf %191, %192 : vector<8x128xf32>
    %194 = vector.extract_strided_slice %174 {offsets = [0, 256], sizes = [8, 128], strides = [1, 1]} : vector<8x384xf32> to vector<8x128xf32>
    %195 = vector.extract_strided_slice %177 {offsets = [0, 256], sizes = [8, 128], strides = [1, 1]} : vector<8x384xf32> to vector<8x128xf32>
    %196 = arith.mulf %185, %195 : vector<8x128xf32>
    %197 = arith.addf %194, %196 : vector<8x128xf32>
    %198 = math.tanh %197 : vector<8x128xf32>
    %199 = arith.mulf %193, %163 : vector<8x128xf32>
    %cst_63 = arith.constant 1.000000e+00 : f32
    %200 = vector.broadcast %cst_63 : f32 to vector<8x128xf32>
    %201 = arith.subf %200, %193 : vector<8x128xf32>
    %202 = arith.mulf %201, %198 : vector<8x128xf32>
    %203 = arith.addf %199, %202 : vector<8x128xf32>
    %c0_64 = arith.constant 0 : index
    %204 = arith.index_cast %171 : i32 to index
    %c0_65 = arith.constant 0 : index
    %c0_66 = arith.constant 0 : index
    %205 = vector.load %arg5[%c0_64, %204, %c0_65, %c0_66] : memref<1x8x8x128xf32, #tpu.memory_space<vmem>>, vector<1x1x8x128xf32>
    %206 = vector.shape_cast %205 : vector<1x1x8x128xf32> to vector<8x128xf32>
    %207 = vector.shape_cast %203 : vector<8x128xf32> to vector<1x1x8x128xf32>
    tpu.vector_store %arg5[%c0_64, %204, %c0_65, %c0_66], %207 {strides = array<i32>} : memref<1x8x8x128xf32, #tpu.memory_space<vmem>>, vector<1x1x8x128xf32>,
    %c5_i32 = arith.constant 5 : i32
    %c2_i32_67 = arith.constant 2 : i32
    %208 = arith.muli %c2_i32_67, %c5_i32 : i32
    %c7_i32_68 = arith.constant 7 : i32
    %209 = arith.subi %c7_i32_68, %208 : i32
    %210 = arith.muli %arg0, %209 : i32
    %211 = arith.addi %c5_i32, %210 : i32
    %c0_69 = arith.constant 0 : index
    %212 = arith.index_cast %211 : i32 to index
    %c0_70 = arith.constant 0 : index
    %c0_71 = arith.constant 0 : index
    %213 = vector.load %arg2[%c0_69, %212, %c0_70, %c0_71] : memref<1x8x8x384xf32, #tpu.memory_space<vmem>>, vector<1x1x8x384xf32>
    %214 = vector.shape_cast %213 : vector<1x1x8x384xf32> to vector<8x384xf32>
    %cst_72 = arith.constant dense<0.000000e+00> : vector<8x384xf32>
    %215 = tpu.matmul %203, %4, %cst_72 {dimension_numbers = #tpu.dot_dimension_numbers<[1], [0], [0], [1], [0, 0, 1, 1], [], []>} : vector<8x128xf32>, vector<128x384xf32>, vector<8x384xf32> -> vector<8x384xf32>
    %216 = vector.broadcast %6 : vector<1x384xf32> to vector<8x384xf32>
    %217 = arith.addf %215, %216 : vector<8x384xf32>
    %218 = vector.extract_strided_slice %214 {offsets = [0, 0], sizes = [8, 128], strides = [1, 1]} : vector<8x384xf32> to vector<8x128xf32>
    %219 = vector.extract_strided_slice %217 {offsets = [0, 0], sizes = [8, 128], strides = [1, 1]} : vector<8x384xf32> to vector<8x128xf32>
    %220 = arith.addf %218, %219 : vector<8x128xf32>
    %221 = arith.negf %220 : vector<8x128xf32>
    %222 = math.exp %221 : vector<8x128xf32>
    %cst_73 = arith.constant 1.000000e+00 : f32
    %223 = vector.broadcast %cst_73 : f32 to vector<8x128xf32>
    %224 = arith.addf %223, %222 : vector<8x128xf32>
    %225 = arith.divf %223, %224 : vector<8x128xf32>
    %226 = vector.extract_strided_slice %214 {offsets = [0, 128], sizes = [8, 128], strides = [1, 1]} : vector<8x384xf32> to vector<8x128xf32>
    %227 = vector.extract_strided_slice %217 {offsets = [0, 128], sizes = [8, 128], strides = [1, 1]} : vector<8x384xf32> to vector<8x128xf32>
    %228 = arith.addf %226, %227 : vector<8x128xf32>
    %229 = arith.negf %228 : vector<8x128xf32>
    %230 = math.exp %229 : vector<8x128xf32>
    %cst_74 = arith.constant 1.000000e+00 : f32
    %231 = vector.broadcast %cst_74 : f32 to vector<8x128xf32>
    %232 = arith.addf %231, %230 : vector<8x128xf32>
    %233 = arith.divf %231, %232 : vector<8x128xf32>
    %234 = vector.extract_strided_slice %214 {offsets = [0, 256], sizes = [8, 128], strides = [1, 1]} : vector<8x384xf32> to vector<8x128xf32>
    %235 = vector.extract_strided_slice %217 {offsets = [0, 256], sizes = [8, 128], strides = [1, 1]} : vector<8x384xf32> to vector<8x128xf32>
    %236 = arith.mulf %225, %235 : vector<8x128xf32>
    %237 = arith.addf %234, %236 : vector<8x128xf32>
    %238 = math.tanh %237 : vector<8x128xf32>
    %239 = arith.mulf %233, %203 : vector<8x128xf32>
    %cst_75 = arith.constant 1.000000e+00 : f32
    %240 = vector.broadcast %cst_75 : f32 to vector<8x128xf32>
    %241 = arith.subf %240, %233 : vector<8x128xf32>
    %242 = arith.mulf %241, %238 : vector<8x128xf32>
    %243 = arith.addf %239, %242 : vector<8x128xf32>
    %c0_76 = arith.constant 0 : index
    %244 = arith.index_cast %211 : i32 to index
    %c0_77 = arith.constant 0 : index
    %c0_78 = arith.constant 0 : index
    %245 = vector.load %arg5[%c0_76, %244, %c0_77, %c0_78] : memref<1x8x8x128xf32, #tpu.memory_space<vmem>>, vector<1x1x8x128xf32>
    %246 = vector.shape_cast %245 : vector<1x1x8x128xf32> to vector<8x128xf32>
    %247 = vector.shape_cast %243 : vector<8x128xf32> to vector<1x1x8x128xf32>
    tpu.vector_store %arg5[%c0_76, %244, %c0_77, %c0_78], %247 {strides = array<i32>} : memref<1x8x8x128xf32, #tpu.memory_space<vmem>>, vector<1x1x8x128xf32>,
    %c6_i32 = arith.constant 6 : i32
    %c2_i32_79 = arith.constant 2 : i32
    %248 = arith.muli %c2_i32_79, %c6_i32 : i32
    %c7_i32_80 = arith.constant 7 : i32
    %249 = arith.subi %c7_i32_80, %248 : i32
    %250 = arith.muli %arg0, %249 : i32
    %251 = arith.addi %c6_i32, %250 : i32
    %c0_81 = arith.constant 0 : index
    %252 = arith.index_cast %251 : i32 to index
    %c0_82 = arith.constant 0 : index
    %c0_83 = arith.constant 0 : index
    %253 = vector.load %arg2[%c0_81, %252, %c0_82, %c0_83] : memref<1x8x8x384xf32, #tpu.memory_space<vmem>>, vector<1x1x8x384xf32>
    %254 = vector.shape_cast %253 : vector<1x1x8x384xf32> to vector<8x384xf32>
    %cst_84 = arith.constant dense<0.000000e+00> : vector<8x384xf32>
    %255 = tpu.matmul %243, %4, %cst_84 {dimension_numbers = #tpu.dot_dimension_numbers<[1], [0], [0], [1], [0, 0, 1, 1], [], []>} : vector<8x128xf32>, vector<128x384xf32>, vector<8x384xf32> -> vector<8x384xf32>
    %256 = vector.broadcast %6 : vector<1x384xf32> to vector<8x384xf32>
    %257 = arith.addf %255, %256 : vector<8x384xf32>
    %258 = vector.extract_strided_slice %254 {offsets = [0, 0], sizes = [8, 128], strides = [1, 1]} : vector<8x384xf32> to vector<8x128xf32>
    %259 = vector.extract_strided_slice %257 {offsets = [0, 0], sizes = [8, 128], strides = [1, 1]} : vector<8x384xf32> to vector<8x128xf32>
    %260 = arith.addf %258, %259 : vector<8x128xf32>
    %261 = arith.negf %260 : vector<8x128xf32>
    %262 = math.exp %261 : vector<8x128xf32>
    %cst_85 = arith.constant 1.000000e+00 : f32
    %263 = vector.broadcast %cst_85 : f32 to vector<8x128xf32>
    %264 = arith.addf %263, %262 : vector<8x128xf32>
    %265 = arith.divf %263, %264 : vector<8x128xf32>
    %266 = vector.extract_strided_slice %254 {offsets = [0, 128], sizes = [8, 128], strides = [1, 1]} : vector<8x384xf32> to vector<8x128xf32>
    %267 = vector.extract_strided_slice %257 {offsets = [0, 128], sizes = [8, 128], strides = [1, 1]} : vector<8x384xf32> to vector<8x128xf32>
    %268 = arith.addf %266, %267 : vector<8x128xf32>
    %269 = arith.negf %268 : vector<8x128xf32>
    %270 = math.exp %269 : vector<8x128xf32>
    %cst_86 = arith.constant 1.000000e+00 : f32
    %271 = vector.broadcast %cst_86 : f32 to vector<8x128xf32>
    %272 = arith.addf %271, %270 : vector<8x128xf32>
    %273 = arith.divf %271, %272 : vector<8x128xf32>
    %274 = vector.extract_strided_slice %254 {offsets = [0, 256], sizes = [8, 128], strides = [1, 1]} : vector<8x384xf32> to vector<8x128xf32>
    %275 = vector.extract_strided_slice %257 {offsets = [0, 256], sizes = [8, 128], strides = [1, 1]} : vector<8x384xf32> to vector<8x128xf32>
    %276 = arith.mulf %265, %275 : vector<8x128xf32>
    %277 = arith.addf %274, %276 : vector<8x128xf32>
    %278 = math.tanh %277 : vector<8x128xf32>
    %279 = arith.mulf %273, %243 : vector<8x128xf32>
    %cst_87 = arith.constant 1.000000e+00 : f32
    %280 = vector.broadcast %cst_87 : f32 to vector<8x128xf32>
    %281 = arith.subf %280, %273 : vector<8x128xf32>
    %282 = arith.mulf %281, %278 : vector<8x128xf32>
    %283 = arith.addf %279, %282 : vector<8x128xf32>
    %c0_88 = arith.constant 0 : index
    %284 = arith.index_cast %251 : i32 to index
    %c0_89 = arith.constant 0 : index
    %c0_90 = arith.constant 0 : index
    %285 = vector.load %arg5[%c0_88, %284, %c0_89, %c0_90] : memref<1x8x8x128xf32, #tpu.memory_space<vmem>>, vector<1x1x8x128xf32>
    %286 = vector.shape_cast %285 : vector<1x1x8x128xf32> to vector<8x128xf32>
    %287 = vector.shape_cast %283 : vector<8x128xf32> to vector<1x1x8x128xf32>
    tpu.vector_store %arg5[%c0_88, %284, %c0_89, %c0_90], %287 {strides = array<i32>} : memref<1x8x8x128xf32, #tpu.memory_space<vmem>>, vector<1x1x8x128xf32>,
    %c7_i32_91 = arith.constant 7 : i32
    %c2_i32_92 = arith.constant 2 : i32
    %288 = arith.muli %c2_i32_92, %c7_i32_91 : i32
    %c7_i32_93 = arith.constant 7 : i32
    %289 = arith.subi %c7_i32_93, %288 : i32
    %290 = arith.muli %arg0, %289 : i32
    %291 = arith.addi %c7_i32_91, %290 : i32
    %c0_94 = arith.constant 0 : index
    %292 = arith.index_cast %291 : i32 to index
    %c0_95 = arith.constant 0 : index
    %c0_96 = arith.constant 0 : index
    %293 = vector.load %arg2[%c0_94, %292, %c0_95, %c0_96] : memref<1x8x8x384xf32, #tpu.memory_space<vmem>>, vector<1x1x8x384xf32>
    %294 = vector.shape_cast %293 : vector<1x1x8x384xf32> to vector<8x384xf32>
    %cst_97 = arith.constant dense<0.000000e+00> : vector<8x384xf32>
    %295 = tpu.matmul %283, %4, %cst_97 {dimension_numbers = #tpu.dot_dimension_numbers<[1], [0], [0], [1], [0, 0, 1, 1], [], []>} : vector<8x128xf32>, vector<128x384xf32>, vector<8x384xf32> -> vector<8x384xf32>
    %296 = vector.broadcast %6 : vector<1x384xf32> to vector<8x384xf32>
    %297 = arith.addf %295, %296 : vector<8x384xf32>
    %298 = vector.extract_strided_slice %294 {offsets = [0, 0], sizes = [8, 128], strides = [1, 1]} : vector<8x384xf32> to vector<8x128xf32>
    %299 = vector.extract_strided_slice %297 {offsets = [0, 0], sizes = [8, 128], strides = [1, 1]} : vector<8x384xf32> to vector<8x128xf32>
    %300 = arith.addf %298, %299 : vector<8x128xf32>
    %301 = arith.negf %300 : vector<8x128xf32>
    %302 = math.exp %301 : vector<8x128xf32>
    %cst_98 = arith.constant 1.000000e+00 : f32
    %303 = vector.broadcast %cst_98 : f32 to vector<8x128xf32>
    %304 = arith.addf %303, %302 : vector<8x128xf32>
    %305 = arith.divf %303, %304 : vector<8x128xf32>
    %306 = vector.extract_strided_slice %294 {offsets = [0, 128], sizes = [8, 128], strides = [1, 1]} : vector<8x384xf32> to vector<8x128xf32>
    %307 = vector.extract_strided_slice %297 {offsets = [0, 128], sizes = [8, 128], strides = [1, 1]} : vector<8x384xf32> to vector<8x128xf32>
    %308 = arith.addf %306, %307 : vector<8x128xf32>
    %309 = arith.negf %308 : vector<8x128xf32>
    %310 = math.exp %309 : vector<8x128xf32>
    %cst_99 = arith.constant 1.000000e+00 : f32
    %311 = vector.broadcast %cst_99 : f32 to vector<8x128xf32>
    %312 = arith.addf %311, %310 : vector<8x128xf32>
    %313 = arith.divf %311, %312 : vector<8x128xf32>
    %314 = vector.extract_strided_slice %294 {offsets = [0, 256], sizes = [8, 128], strides = [1, 1]} : vector<8x384xf32> to vector<8x128xf32>
    %315 = vector.extract_strided_slice %297 {offsets = [0, 256], sizes = [8, 128], strides = [1, 1]} : vector<8x384xf32> to vector<8x128xf32>
    %316 = arith.mulf %305, %315 : vector<8x128xf32>
    %317 = arith.addf %314, %316 : vector<8x128xf32>
    %318 = math.tanh %317 : vector<8x128xf32>
    %319 = arith.mulf %313, %283 : vector<8x128xf32>
    %cst_100 = arith.constant 1.000000e+00 : f32
    %320 = vector.broadcast %cst_100 : f32 to vector<8x128xf32>
    %321 = arith.subf %320, %313 : vector<8x128xf32>
    %322 = arith.mulf %321, %318 : vector<8x128xf32>
    %323 = arith.addf %319, %322 : vector<8x128xf32>
    %c0_101 = arith.constant 0 : index
    %324 = arith.index_cast %291 : i32 to index
    %c0_102 = arith.constant 0 : index
    %c0_103 = arith.constant 0 : index
    %325 = vector.load %arg5[%c0_101, %324, %c0_102, %c0_103] : memref<1x8x8x128xf32, #tpu.memory_space<vmem>>, vector<1x1x8x128xf32>
    %326 = vector.shape_cast %325 : vector<1x1x8x128xf32> to vector<8x128xf32>
    %327 = vector.shape_cast %323 : vector<8x128xf32> to vector<1x1x8x128xf32>
    tpu.vector_store %arg5[%c0_101, %324, %c0_102, %c0_103], %327 {strides = array<i32>} : memref<1x8x8x128xf32, #tpu.memory_space<vmem>>, vector<1x1x8x128xf32>,
    %c8_i32 = arith.constant 8 : i32
    %c0_104 = arith.constant 0 : index
    %c0_105 = arith.constant 0 : index
    %328 = vector.load %arg6[%c0_104, %c0_105] : memref<8x128xf32, #tpu.memory_space<vmem>>, vector<8x128xf32>
    tpu.vector_store %arg6[%c0_104, %c0_105], %323 {strides = array<i32>} : memref<8x128xf32, #tpu.memory_space<vmem>>, vector<8x128xf32>,
    return
  }
  func.func @transform_0(%arg0: i32, %arg1: i32) -> (i32, i32, i32, i32) {
    %c2_i32 = arith.constant 2 : i32
    %0 = arith.muli %c2_i32, %arg1 : i32
    %c0_i32 = arith.constant 0 : i32
    %1 = arith.subi %c0_i32, %0 : i32
    %2 = arith.muli %arg0, %1 : i32
    %3 = arith.addi %arg1, %2 : i32
    %c0_i32_0 = arith.constant 0 : i32
    %c0_i32_1 = arith.constant 0 : i32
    %c0_i32_2 = arith.constant 0 : i32
    return %arg0, %3, %c0_i32_0, %c0_i32_1 : i32, i32, i32, i32
  }
  func.func @transform_1(%arg0: i32, %arg1: i32) -> (i32, i32, i32) {
    %c0_i32 = arith.constant 0 : i32
    %c0_i32_0 = arith.constant 0 : i32
    %c0_i32_1 = arith.constant 0 : i32
    return %arg0, %c0_i32, %c0_i32_0 : i32, i32, i32
  }
  func.func @transform_2(%arg0: i32, %arg1: i32) -> (i32, i32, i32) {
    %c0_i32 = arith.constant 0 : i32
    %c0_i32_0 = arith.constant 0 : i32
    %c0_i32_1 = arith.constant 0 : i32
    return %arg0, %c0_i32, %c0_i32_0 : i32, i32, i32
  }
  func.func @transform_3(%arg0: i32, %arg1: i32) -> (i32, i32, i32, i32) {
    %c2_i32 = arith.constant 2 : i32
    %0 = arith.muli %c2_i32, %arg1 : i32
    %c0_i32 = arith.constant 0 : i32
    %1 = arith.subi %c0_i32, %0 : i32
    %2 = arith.muli %arg0, %1 : i32
    %3 = arith.addi %arg1, %2 : i32
    %c0_i32_0 = arith.constant 0 : i32
    %c0_i32_1 = arith.constant 0 : i32
    %c0_i32_2 = arith.constant 0 : i32
    return %arg0, %3, %c0_i32_0, %c0_i32_1 : i32, i32, i32, i32
  }
}

</mosaic_0001>

<bundles_post_ra>
// kernel: tpu_custom_call.1
= control target key start
LH: loop header
LB: loop body
LE: loop exit
PB: predicated region body
PF: predicated region fallthrough
CT: control target
= control target key end

     0   :  { %s2963_s0 = inlined_call_operand.hbm [shape: f32[2,8,8,384], index: 0, kind: input, shape index: {}]   ;;  %s2964_s1 = inlined_call_operand.hbm [shape: f32[2,128,384], index: 1, kind: input, shape index: {}]   ;;  %s2965_s2 = inlined_call_operand.hbm [shape: f32[2,1,384], index: 2, kind: input, shape index: {}]   ;;  %s2966_s3 = inlined_call_operand.hbm [shape: f32[2,8,8,128], index: 3, kind: output, shape index: {}]  }
   0x1   :  { %2991 = sst [smem:[#allocation28_spill]] %s2964_s1 }
   0x2   :  { %8 = vsyncpa [#allocation4], 0 }
   0x3   :  { %10 = vsyncpa [#allocation4 + $0x1], 0 }
   0x4   :  { %11 = vsyncpa [#allocation7], 0 }
   0x5   :  { %13 = vsyncpa [#allocation7 + $0x1], 0 }
   0x6   :  { %14 = vsyncpa [#allocation5], 0 }
   0x7   :  { %16 = vsyncpa [#allocation5 + $0x1], 0  ;;  %s2019_s12 = smov 0   ;;  %s2021_s13 = smov 0  }
   0x8   :  { %s2023_s14 = smov 0   ;;  %s2025_s15 = smov 0  }
   0x9   :  { %s2027_s16 = smov 0   ;;  %s2029_s17 = smov 0  }
   0xa LB: > { %2992 = sst [smem:[#allocation13_spill]] %s1972_s12  ;;  %s2050_s18 = sadd.s32 4294967295, %s1992_s17   ;;  %s1992_s17 = sphi %s2029_s17, %s22_s17   ;;  %s1988_s16 = sphi %s2027_s16, %s3040_s16   ;;  %s1984_s15 = sphi %s2025_s15, %s3039_s15   ;;  %s1980_s14 = sphi %s2023_s14, %s3035_s14   ;;  %s1976_s13 = sphi %s2021_s13, %s3038_s13   ;;  %s1972_s12 = sphi %s2019_s12, %s3037_s12  }
   0xb   : > { %2993 = sst [smem:[#allocation14_spill]] %s1980_s14  ;;  %s1531_s19 = sadd.s32 4294967294, %s1992_s17  }
   0xc   : > { %2994 = sst [smem:[#allocation15_spill]] %s1992_s17  ;;  %s34_s20 = sadd.s32 1, %s1988_s16 }
   0xd   : > { %s51_s21 = sadd.s32 1, %s1980_s14  ;;  %p36_p0 = scmp.ge.s32.totalorder %s34_s20, 2 }
   0xe   : > { %p58_p1 = scmp.ne.s32.totalorder %s1980_s14, %s1976_s13  ;;  %p59_p2 = scmp.eq.s32.totalorder %s1992_s17, 0 }
   0xf   : > { %p64_p3 = scmp.ne.s32.totalorder %s1976_s13, %s1972_s12  ;;  %s3042_s20 = smov (%p36_p0, %s34_s20), 0 }
  0x10   : > { %2995 = sst [smem:[#allocation16_spill]] %s3042_s20  ;;  %p2062_p4 = por %p59_p2, %p58_p1 }
  0x11   : > { %p65_p5 = scmp.eq.s32.totalorder %s2050_s18, 0  ;;  %s46_s23 = ssub.s32 %s1988_s16, %s3042_s20 }
  0x12   : > { %p150_p6 = scmp.eq.s32.totalorder %s2050_s18, 1  ;;  %p49_p7 = scmp.eq.s32.totalorder %s46_s23, 0 }
  0x13   : > { %p2070_p8 = por %p65_p5, %p64_p3  ;;  %p156_p10 = scmp.eq.s32.totalorder %s1531_s19, 1 }
  0x14   : > { %p2074_p9 = por %p150_p6, %p58_p1  ;;  %p1533_p12 = scmp.ge.s32.totalorder %s1992_s17, 2 }
  0x15   : > { %s2079_s26 = scalar_select %p49_p7, %s1980_s14, %s51_s21  }
  0x16   : > { %s2998_s25 = scalar_select %p2074_p9, 1, 0 }
  0x17   : > { %3000 = sst [smem:[#allocation18_spill]] %s2079_s26  ;;  %p2081_p11 = por %p156_p10, %p64_p3 }
  0x18   : > { %2999 = sst [smem:[#allocation17_spill]] %s2998_s25  ;;  %p1633_p13 = scmp.lt.s32.totalorder %s1992_s17, 2 }
  0x19   : > { %s3001_s27 = scalar_select %p2081_p11, 1, 0 }
  0x1a   : > { %s2088_s28 = sand.u32 1, %s1980_s14   ;;  %p2092_p0 = pnand %p1633_p13, %p2062_p4 }
  0x1b   : > { %3002 = sst [smem:[#allocation19_spill]] %s3001_s27  ;;  %s205_s30 = sand.u32 1, %s1992_s17  }
  0x1c   : > { %s1604_s4 = smul.u32 384, %s2088_s28  ;;  %p1536_p1 = scmp.ge.s32.totalorder %s1992_s17, 1 }
  0x1d   : > { %s1605_s5 = smul.u32 384, %s1988_s16  ;;  %s3004_s1 = sld [smem:[#allocation28_spill]] }
  0x1e   : > { %s209_s9 = scalar_lea.vmem [#allocation6], %s1604_s4  ;;  %p244_p2 = scmp.lt.s32.totalorder %s1992_s17, 3 }
  0x1f   : > { %s217_s10 = sshll.u32 %s209_s9, 4  ;;  %s206_s19 = scalar_lea.sflag [#allocation7], %s205_s30  ;;  %s218_s10 = int_to_ptr.vmem [resolvable:$true] %s217_s10 }
  0x20   : > { %s1994_s21 = smov 384   ;;  %s1995_s22 = smov 24  }
  0x21   : > { %p2106_p3 = pnand %p1536_p1, %p244_p2  ;;  %s1602_s6 = smul.u32 192, %s2088_s28 }
  0x22   : > { %s1606_s4 = smul.u32 3, %s2088_s28  ;;  %s177_s26 = scalar_lea.sflag [#allocation4], %s2088_s28 }
  0x23   : > { %s214_s8 = scalar_lea.hbm %s3004_s1, %s1605_s5  ;;  %s1603_s5 = smul.u32 192, %s1988_s16 }
  0x24   : > { %s215_s11 = sshll.u32 %s214_s8, 4  ;;  %s180_s1 = scalar_lea.vmem [#allocation3], %s1602_s6  ;;  %s216_s11 = int_to_ptr.hbm [resolvable:$true] %s215_s11 }
  0x25   : > { %1625 = dma.hbm_to_vmem [thread:$0]  (!%p2092_p0), %s216_s11, 6144, %s218_s10, %s206_s19, %s1994_s21, %s1994_s21, %s1995_s22  }
  0x26   : > { %s192_s9 = scalar_lea.hbm %s2963_s0, %s1603_s5  ;;  %s195_s20 = sshll.u32 %s180_s1, 4  ;;  %s196_s20 = int_to_ptr.vmem [resolvable:$true] %s195_s20 }
  0x27   : > { %s193_s30 = sshll.u32 %s192_s9, 4  ;;  %s1607_s10 = smul.u32 3, %s1988_s16  ;;  %s194_s30 = int_to_ptr.hbm [resolvable:$true] %s193_s30 }
  0x28   : > { %1622 = dma.hbm_to_vmem [thread:$0]  (!%p2092_p0), %s194_s30, 3072, %s196_s20, %s177_s26, %s1994_s21, %s1994_s21, %s1995_s22  }
  0x29   : > { %s231_s11 = scalar_lea.vmem [#allocation8], %s1606_s4  ;;  %s235_s12 = scalar_lea.hbm %s2965_s2, %s1607_s10 }
  0x2a   : > { %s239_s14 = sshll.u32 %s231_s11, 4  ;;  %s237_s25 = sshll.u32 %s235_s12, 4  ;;  %s240_s14 = int_to_ptr.vmem [resolvable:$true] %s239_s14  ;;  %s238_s25 = int_to_ptr.hbm [resolvable:$true] %s237_s25 }
  0x2b   : > { %1628 = dma.hbm_to_vmem [thread:$0]  (!%p2092_p0), %s238_s25, 48, %s240_s14, %s206_s19  }
  0x2c   : > { %248 = sbr.rel (%p2106_p3) target bundleno = 1502 (0x5de), region = 32 }
  0x31   : > { %s2128_s1 = sand.u32 1, %s1976_s13  }
  0x32   : > { %s1608_s20 = smul.u32 192, %s2128_s1  ;;  %s251_s26 = scalar_lea.sflag [#allocation4], %s2128_s1 }
  0x34   : > { %s2132_s28 = scalar_lea.vmem [#allocation3], %s1608_s20 }
  0x35   : > { %1959 = dma.done.wait (%p2070_p8), %s251_s26, 3072  }
  0x36   : > { %1961 = vsyncadd (%p2070_p8), %s251_s26, 4294964224  ;;  %s260_s12 = sand.u32 1, %s2050_s18   ;;  %s1609_s14 = smul.u32 384, %s2128_s1 }
  0x37   : > { %s261_s17 = scalar_lea.sflag [#allocation7], %s260_s12 }
  0x38   : > { %s2140_s25 = scalar_lea.vmem [#allocation6], %s1609_s14 }
  0x39   : > { %1963 = dma.done.wait (%p2070_p8), %s261_s17, 6192  }
  0x3a   : > { %1965 = vsyncadd (%p2070_p8), %s261_s17, 4294961104  ;;  %v2147_v0 = vld [vmem:[%s2140_s25 + $0x168] sm:$0xff]  ;;  %v2150_v1 = vld [vmem:[%s2140_s25 + $0x170] sm:$0xff]  ;;  %v1996_v44 = vmov 0.0   ;;  %s1610_s18 = smul.u32 3, %s2128_s1  ;;  %s1537_s19 = sshll.u32 %s2128_s1, 6 }
  0x3b   : > { %v2153_v2 = vld [vmem:[%s2140_s25 + $0x150] sm:$0xff]  ;;  %387 = vmatpush.msra.mxu0 %v2147_v0  ;;  %407 = vmatpush.msra.mxu1 %v2150_v1  ;;  %v2158_v3 = vld [vmem:[%s2140_s25 + $0x158] sm:$0xff]  ;;  %v2164_v5 = vld [vmem:[%s2140_s25 + $0x140] sm:$0xff]  ;;  %s1599_s24 = smul.u32 168, %s1984_s15  ;;  %s2485_s22 = scalar_lea.vmem [#allocation9], %s1537_s19 }
  0x3c   : > { %v2161_v4 = vld [vmem:[%s2140_s25 + $0x138] sm:$0xff]  ;;  %505 = vmatpush.msra.mxu3 %v2147_v0  ;;  %v2170_v6 = vld [vmem:[%s2140_s25 + $0x120] sm:$0xff]  ;;  %v2173_v7 = vld [vmem:[%s2140_s25 + $0x128] sm:$0xff]  ;;  %s274_s27 = scalar_lea.vmem [#allocation8], %s1610_s18  ;;  %s1542_s21 = smul.u32 56, %s1984_s15 }
  0x3d   : > { %388 = vmatpush.msra.mxu0 %v2153_v2  ;;  %408 = vmatpush.msra.mxu1 %v2158_v3  ;;  %v2179_v8 = vld [vmem:[%s2140_s25 + $0x108] sm:$0xff]  ;;  %v2182_v9 = vld [vmem:[%s2140_s25 + $0x110] sm:$0xff]  ;;  %v2191_v11 = vld [vmem:[%s2140_s25 + $0xf8] sm:$0xff]  ;;  %s2469_s29 = scalar_lea.vmem %s2132_s28, %s1599_s24 [#allocation3]  ;;  %s1543_s6 = smul.u32 120, %s1984_s15 }
  0x3e   : > { %506 = vmatpush.msra.mxu3 %v2153_v2  ;;  %v2188_v10 = vld [vmem:[%s2140_s25 + $0xf0] sm:$0xff]  ;;  %v2194_v12 = vld [vmem:[%s2140_s25 + $0x178] sm:$0xff]  ;;  %v2200_v13 = vld [vmem:[%s2140_s25 + $0x160] sm:$0xff]  ;;  %s495_s23 = scalar_lea.vmem %s2485_s22, %s1542_s21 [#allocation9]  ;;  %s1549_s4 = smul.u32 40, %s1984_s15 }
  0x3f   : > { %389 = vmatpush.msra.mxu0 %v2161_v4  ;;  %409 = vmatpush.msra.mxu1 %v2164_v5  ;;  %v2203_v14 = vld [vmem:[%s2140_s25 + $0xd8] sm:$0xff]  ;;  %v2206_v15 = vld [vmem:[%s2140_s25 + $0xe0] sm:$0xff]  ;;  %v2213_v16 = vld [vmem:[%s2140_s25 + $0x148] sm:$0xff]  ;;  %s2544_s5 = scalar_lea.vmem %s2132_s28, %s1543_s6 [#allocation3]  ;;  %s1551_s8 = smul.u32 72, %s1984_s15 }
  0x40   : > { %507 = vmatpush.msra.mxu3 %v2161_v4  ;;  %427 = vmatpush.msra.mxu2 %v2194_v12  ;;  %v2216_v17 = vld [vmem:[%s2140_s25 + $0xc0] sm:$0xff]  ;;  %v2219_v18 = vld [vmem:[%s2140_s25 + $0xc8] sm:$0xff]  ;;  %v2226_v19 = vld [vmem:[%s2140_s25 + $0x130] sm:$0xff]  ;;  %s1424_s7 = scalar_lea.vmem %s2485_s22, %s1549_s4 [#allocation9]  ;;  %s1557_s30 = smul.u32 24, %s1984_s15 }
  0x41   : > { %390 = vmatpush.msra.mxu0 %v2170_v6  ;;  %410 = vmatpush.msra.mxu1 %v2173_v7  ;;  %v2229_v20 = vld [vmem:[%s2140_s25 + $0xa8] sm:$0xff]  ;;  %v2232_v21 = vld [vmem:[%s2140_s25 + $0xb0] sm:$0xff]  ;;  %v2239_v22 = vld [vmem:[%s2140_s25 + $0x118] sm:$0xff]  ;;  %s2611_s9 = scalar_lea.vmem %s2132_s28, %s1551_s8 [#allocation3]  ;;  %s1564_s20 = sshll.u32 %s1984_s15, 3 }
  0x42   : > { %508 = vmatpush.msra.mxu3 %v2170_v6  ;;  %428 = vmatpush.msra.mxu2 %v2200_v13  ;;  %v2242_v23 = vld [vmem:[%s2140_s25 + $0x90] sm:$0xff]  ;;  %v2245_v24 = vld [vmem:[%s2140_s25 + $0x98] sm:$0xff]  ;;  %v2252_v25 = vld [vmem:[%s2140_s25 + $0x100] sm:$0xff]  ;;  %s1432_s10 = scalar_lea.vmem %s2485_s22, %s1557_s30 [#allocation9]  ;;  %s2729_s11 = scalar_lea.vmem %s2132_s28, %s1557_s30 [#allocation3] }
  0x43   : > { %391 = vmatpush.msra.mxu0 %v2179_v8  ;;  %411 = vmatpush.msra.mxu1 %v2182_v9  ;;  %v2255_v26 = vld [vmem:[%s2140_s25 + $0x78] sm:$0xff]  ;;  %v2258_v27 = vld [vmem:[%s2140_s25 + $0x80] sm:$0xff]  ;;  %v2265_v28 = vld [vmem:[%s2140_s25 + $0xe8] sm:$0xff]  ;;  %s1438_s26 = scalar_lea.vmem %s2485_s22, %s1564_s20 [#allocation9]  ;;  %s850_s12 = ssub.s32 4, %s1984_s15 }
  0x44   : > { %509 = vmatpush.msra.mxu3 %v2179_v8  ;;  %429 = vmatpush.msra.mxu2 %v2213_v16  ;;  %v2268_v29 = vld [vmem:[%s2140_s25 + $0x60] sm:$0xff]  ;;  %v2271_v30 = vld [vmem:[%s2140_s25 + $0x68] sm:$0xff]  ;;  %v2278_v31 = vld [vmem:[%s2140_s25 + $0xd0] sm:$0xff]  ;;  %s1600_s14 = smul.u32 24, %s850_s12  ;;  %s1341_s20 = sshll.u32 %s2485_s22, 4  ;;  %s1342_s20 = int_to_ptr.vmem [resolvable:$true] %s1341_s20 }
  0x45   : > { %392 = vmatpush.msra.mxu0 %v2188_v10  ;;  %412 = vmatpush.msra.mxu1 %v2191_v11  ;;  %v2281_v32 = vld [vmem:[%s2140_s25 + $0x48] sm:$0xff]  ;;  %v2284_v33 = vld [vmem:[%s2140_s25 + $0x50] sm:$0xff]  ;;  %v2291_v34 = vld [vmem:[%s2140_s25 + $0xb8] sm:$0xff]  ;;  %s1570_s24 = smul.u32 4294967224, %s1984_s15 }
  0x46   : > { %510 = vmatpush.msra.mxu3 %v2188_v10  ;;  %430 = vmatpush.msra.mxu2 %v2226_v19  ;;  %v2294_v35 = vld [vmem:[%s2140_s25 + $0x30] sm:$0xff]  ;;  %v2297_v36 = vld [vmem:[%s2140_s25 + $0x38] sm:$0xff]  ;;  %v2304_v37 = vld [vmem:[%s2140_s25 + $0xa0] sm:$0xff]  ;;  %s2846_s17 = scalar_lea.vmem %s2132_s28, %s1600_s14 [#allocation3]  ;;  %s1578_s21 = smul.u32 4294967176, %s1984_s15 }
  0x47   : > { %393 = vmatpush.msra.mxu0 %v2203_v14  ;;  %413 = vmatpush.msra.mxu1 %v2206_v15  ;;  %v2307_v38 = vld [vmem:[%s2140_s25 + $0x18] sm:$0xff]  ;;  %v2310_v39 = vld [vmem:[%s2140_s25 + $0x20] sm:$0xff]  ;;  %v2317_v40 = vld [vmem:[%s2140_s25 + $0x88] sm:$0xff]  ;;  %s1584_s6 = smul.u32 4294967256, %s1984_s15  ;;  %s1323_s14 = scalar_lea.sflag [#allocation5], %s2128_s1 }
  0x48   : > { %511 = vmatpush.msra.mxu3 %v2203_v14  ;;  %431 = vmatpush.msra.mxu2 %v2239_v22  ;;  %3006 = vst [vmem:[#allocation20_spill] sm:$0xff] %v2307_v38  ;;  %v2320_v41 = vld [vmem:[%s2140_s25] sm:$0xff]  ;;  %v2323_v42 = vld [vmem:[%s2140_s25 + $0x8] sm:$0xff]  ;;  %v2331_v43 = vld [vmem:[%s2140_s25 + $0x70] sm:$0xff]  ;;  %s1586_s4 = smul.u32 4294967128, %s1984_s15 }
  0x49   : > { %394 = vmatpush.msra.mxu0 %v2216_v17  ;;  %414 = vmatpush.msra.mxu1 %v2219_v18  ;;  %3007 = vst [vmem:[#allocation21_spill] sm:$0xff] %v2310_v39  ;;  %v2337_v45 = vld [vmem:[%s2140_s25 + $0x58] sm:$0xff]  ;;  %v2342_v46 = vld [vmem:[%s2140_s25 + $0x40] sm:$0xff]  ;;  %v2349_v47 = vld [vmem:[%s2140_s25 + $0x28] sm:$0xff] }
  0x4a   : > { %512 = vmatpush.msra.mxu3 %v2216_v17  ;;  %432 = vmatpush.msra.mxu2 %v2252_v25  ;;  %3008 = vst [vmem:[#allocation22_spill] sm:$0xff] %v2320_v41  ;;  %v2356_v48 = vld [vmem:[%s2140_s25 + $0x10] sm:$0xff]  ;;  %v371_v49 = vld [vmem:[%s274_s27] sm:$0x7]  ;;  %v378_v54 = vld [vmem:[%s2469_s29 + $0x8] sm:$0xff]  ;;  %s2882_s27 = scalar_lea.vmem %s2132_s28, %s1570_s24 [#allocation3]  ;;  %s1926_s24 = scalar_lea.hbm %s2966_s3, 128 }
  0x4b   : > { %395 = vmatpush.msra.mxu0 %v2229_v20  ;;  %415 = vmatpush.msra.mxu1 %v2232_v21  ;;  %3009 = vst [vmem:[#allocation23_spill] sm:$0xff] %v2323_v42  ;;  %v2471_v50 = vperm.slane %v371_v49, 0  ;;  %v2473_v51 = vperm.slane %v371_v49, 1  ;;  %v377_v52 = vld [vmem:[%s2469_s29] sm:$0xff] }
  0x4c   : > { %513 = vmatpush.msra.mxu3 %v2229_v20  ;;  %433 = vmatpush.msra.mxu2 %v2265_v28  ;;  %3010 = vst [vmem:[#allocation24_spill] sm:$0xff] %v2349_v47 }
  0x4d   : > { %396 = vmatpush.msra.mxu0 %v2242_v23  ;;  %416 = vmatpush.msra.mxu1 %v2245_v24  ;;  %3011 = vst [vmem:[#allocation25_spill] sm:$0xff] %v2356_v48 }
  0x4e   : > { %514 = vmatpush.msra.mxu3 %v2242_v23  ;;  %434 = vmatpush.msra.mxu2 %v2278_v31  ;;  %3012 = vst [vmem:[#allocation26_spill] sm:$0xff] %v2471_v50 }
  0x4f   : > { %397 = vmatpush.msra.mxu0 %v2255_v26  ;;  %417 = vmatpush.msra.mxu1 %v2258_v27  ;;  %3013 = vst [vmem:[#allocation27_spill] sm:$0xff] %v2473_v51 }
  0x50   : > { %515 = vmatpush.msra.mxu3 %v2255_v26  ;;  %435 = vmatpush.msra.mxu2 %v2291_v34 }
  0x51   : > { %398 = vmatpush.msra.mxu0 %v2268_v29  ;;  %418 = vmatpush.msra.mxu1 %v2271_v30 }
  0x52   : > { %516 = vmatpush.msra.mxu3 %v2268_v29  ;;  %436 = vmatpush.msra.mxu2 %v2304_v37 }
  0x53   : > { %399 = vmatpush.msra.mxu0 %v2281_v32  ;;  %419 = vmatpush.msra.mxu1 %v2284_v33 }
  0x54   : > { %517 = vmatpush.msra.mxu3 %v2281_v32  ;;  %437 = vmatpush.msra.mxu2 %v2317_v40 }
  0x55   : > { %400 = vmatpush.msra.mxu0 %v2294_v35  ;;  %420 = vmatpush.msra.mxu1 %v2297_v36 }
  0x56   : > { %518 = vmatpush.msra.mxu3 %v2294_v35  ;;  %438 = vmatpush.msra.mxu2 %v2331_v43 }
  0x57   : > { %401 = vmatpush.msra.mxu0 %v2307_v38  ;;  %421 = vmatpush.msra.mxu1 %v2310_v39 }
  0x58   : > { %519 = vmatpush.msra.mxu3 %v2307_v38  ;;  %439 = vmatpush.msra.mxu2 %v2337_v45 }
  0x59   : > { %402 = vmatpush.msra.mxu0 %v2320_v41  ;;  %422 = vmatpush.msra.mxu1 %v2323_v42 }
  0x5a   : > { %403 = vmatmul.f32.vlgmr.msra.gmra.mxu0 %v1996_v44  ;;  %423 = vmatmul.f32.vlgmr.msra.gmra.mxu1 %v1996_v44 }
  0x5b   : > { %525 = vmatpush.msrb.mxu0 %v2150_v1  ;;  %545 = vmatpush.msrb.mxu1 %v2194_v12 }
  0x5c   : > { %520 = vmatpush.msra.mxu3 %v2320_v41  ;;  %440 = vmatpush.msra.mxu2 %v2342_v46 }
  0x5d   : > { %526 = vmatpush.msrb.mxu0 %v2158_v3  ;;  %546 = vmatpush.msrb.mxu1 %v2200_v13 }
  0x5e   : > { %643 = vmatpush.msrb.mxu3 %v2150_v1  ;;  %441 = vmatpush.msra.mxu2 %v2349_v47 }
  0x5f   : > { %527 = vmatpush.msrb.mxu0 %v2164_v5  ;;  %547 = vmatpush.msrb.mxu1 %v2213_v16 }
  0x60   : > { %644 = vmatpush.msrb.mxu3 %v2158_v3  ;;  %442 = vmatpush.msra.mxu2 %v2356_v48 }
  0x61   : > { %528 = vmatpush.msrb.mxu0 %v2173_v7  ;;  %548 = vmatpush.msrb.mxu1 %v2226_v19 }
  0x62   : > { %645 = vmatpush.msrb.mxu3 %v2164_v5  ;;  %443 = vmatmul.f32.vlgmr.msra.gmra.mxu2 %v1996_v44 }
  0x63   : > { %529 = vmatpush.msrb.mxu0 %v2182_v9  ;;  %549 = vmatpush.msrb.mxu1 %v2239_v22 }
  0x64   : > { %623 = vmatpush.msrb.mxu2 %v2147_v0  ;;  %646 = vmatpush.msrb.mxu3 %v2173_v7 }
  0x65   : > { %530 = vmatpush.msrb.mxu0 %v2191_v11  ;;  %550 = vmatpush.msrb.mxu1 %v2252_v25 }
  0x66   : > { %624 = vmatpush.msrb.mxu2 %v2153_v2  ;;  %647 = vmatpush.msrb.mxu3 %v2182_v9 }
  0x67   : > { %531 = vmatpush.msrb.mxu0 %v2206_v15  ;;  %551 = vmatpush.msrb.mxu1 %v2265_v28 }
  0x68   : > { %625 = vmatpush.msrb.mxu2 %v2161_v4  ;;  %648 = vmatpush.msrb.mxu3 %v2191_v11 }
  0x69   : > { %532 = vmatpush.msrb.mxu0 %v2219_v18  ;;  %552 = vmatpush.msrb.mxu1 %v2278_v31 }
  0x6a   : > { %626 = vmatpush.msrb.mxu2 %v2170_v6  ;;  %649 = vmatpush.msrb.mxu3 %v2206_v15 }
  0x6b   : > { %533 = vmatpush.msrb.mxu0 %v2232_v21  ;;  %553 = vmatpush.msrb.mxu1 %v2291_v34 }
  0x6c   : > { %627 = vmatpush.msrb.mxu2 %v2179_v8  ;;  %650 = vmatpush.msrb.mxu3 %v2219_v18 }
  0x6d   : > { %534 = vmatpush.msrb.mxu0 %v2245_v24  ;;  %554 = vmatpush.msrb.mxu1 %v2304_v37 }
  0x6e   : > { %628 = vmatpush.msrb.mxu2 %v2188_v10  ;;  %651 = vmatpush.msrb.mxu3 %v2232_v21 }
  0x6f   : > { %535 = vmatpush.msrb.mxu0 %v2258_v27  ;;  %555 = vmatpush.msrb.mxu1 %v2317_v40 }
  0x70   : > { %629 = vmatpush.msrb.mxu2 %v2203_v14  ;;  %652 = vmatpush.msrb.mxu3 %v2245_v24 }
  0x71   : > { %536 = vmatpush.msrb.mxu0 %v2271_v30  ;;  %556 = vmatpush.msrb.mxu1 %v2331_v43 }
  0x72   : > { %630 = vmatpush.msrb.mxu2 %v2216_v17  ;;  %653 = vmatpush.msrb.mxu3 %v2258_v27 }
  0x73   : > { %537 = vmatpush.msrb.mxu0 %v2284_v33  ;;  %557 = vmatpush.msrb.mxu1 %v2337_v45 }
  0x74   : > { %631 = vmatpush.msrb.mxu2 %v2229_v20  ;;  %654 = vmatpush.msrb.mxu3 %v2271_v30 }
  0x75   : > { %538 = vmatpush.msrb.mxu0 %v2297_v36  ;;  %558 = vmatpush.msrb.mxu1 %v2342_v46 }
  0x76   : > { %632 = vmatpush.msrb.mxu2 %v2242_v23  ;;  %655 = vmatpush.msrb.mxu3 %v2284_v33 }
  0x77   : > { %539 = vmatpush.msrb.mxu0 %v2310_v39  ;;  %559 = vmatpush.msrb.mxu1 %v2349_v47 }
  0x78   : > { %633 = vmatpush.msrb.mxu2 %v2255_v26  ;;  %656 = vmatpush.msrb.mxu3 %v2297_v36 }
  0x79   : > { %540 = vmatpush.msrb.mxu0 %v2323_v42  ;;  %560 = vmatpush.msrb.mxu1 %v2356_v48 }
  0x7a   : > { %634 = vmatpush.msrb.mxu2 %v2268_v29  ;;  %657 = vmatpush.msrb.mxu3 %v2310_v39 }
  0x7b   : > { %663 = vmatpush.msra.mxu0 %v2194_v12  ;;  %740 = vmatpush.msra.mxu1 %v2147_v0 }
  0x7c   : > { %635 = vmatpush.msrb.mxu2 %v2281_v32  ;;  %658 = vmatpush.msrb.mxu3 %v2323_v42 }
  0x7d   : > { %664 = vmatpush.msra.mxu0 %v2200_v13  ;;  %741 = vmatpush.msra.mxu1 %v2153_v2 }
  0x7e   : > { %636 = vmatpush.msrb.mxu2 %v2294_v35 }
  0x7f   : > { %665 = vmatpush.msra.mxu0 %v2213_v16  ;;  %742 = vmatpush.msra.mxu1 %v2161_v4 }
  0x80   : > { %637 = vmatpush.msrb.mxu2 %v2307_v38 }
  0x81   : > { %666 = vmatpush.msra.mxu0 %v2226_v19  ;;  %743 = vmatpush.msra.mxu1 %v2170_v6 }
  0x82   : > { %638 = vmatpush.msrb.mxu2 %v2320_v41 }
  0x83   : > { %667 = vmatpush.msra.mxu0 %v2239_v22  ;;  %744 = vmatpush.msra.mxu1 %v2179_v8 }
  0x84   : > { %760 = vmatpush.msra.mxu2 %v2150_v1 }
  0x85   : > { %668 = vmatpush.msra.mxu0 %v2252_v25  ;;  %745 = vmatpush.msra.mxu1 %v2188_v10 }
  0x86   : > { %761 = vmatpush.msra.mxu2 %v2158_v3 }
  0x87   : > { %669 = vmatpush.msra.mxu0 %v2265_v28  ;;  %746 = vmatpush.msra.mxu1 %v2203_v14 }
  0x88   : > { %762 = vmatpush.msra.mxu2 %v2164_v5 }
  0x89   : > { %670 = vmatpush.msra.mxu0 %v2278_v31  ;;  %747 = vmatpush.msra.mxu1 %v2216_v17 }
  0x8a   : > { %763 = vmatpush.msra.mxu2 %v2173_v7 }
  0x8b   : > { %671 = vmatpush.msra.mxu0 %v2291_v34  ;;  %748 = vmatpush.msra.mxu1 %v2229_v20 }
  0x8c   : > { %764 = vmatpush.msra.mxu2 %v2182_v9 }
  0x8d   : > { %672 = vmatpush.msra.mxu0 %v2304_v37  ;;  %749 = vmatpush.msra.mxu1 %v2242_v23 }
  0x8e   : > { %765 = vmatpush.msra.mxu2 %v2191_v11 }
  0x8f   : > { %673 = vmatpush.msra.mxu0 %v2317_v40  ;;  %750 = vmatpush.msra.mxu1 %v2255_v26 }
  0x90   : > { %766 = vmatpush.msra.mxu2 %v2206_v15 }
  0x91   : > { %674 = vmatpush.msra.mxu0 %v2331_v43  ;;  %751 = vmatpush.msra.mxu1 %v2268_v29 }
  0x92   : > { %767 = vmatpush.msra.mxu2 %v2219_v18 }
  0x93   : > { %675 = vmatpush.msra.mxu0 %v2337_v45  ;;  %752 = vmatpush.msra.mxu1 %v2281_v32 }
  0x94   : > { %768 = vmatpush.msra.mxu2 %v2232_v21 }
  0x95   : > { %676 = vmatpush.msra.mxu0 %v2342_v46  ;;  %753 = vmatpush.msra.mxu1 %v2294_v35 }
  0x96   : > { %769 = vmatpush.msra.mxu2 %v2245_v24 }
  0x97   : > { %677 = vmatpush.msra.mxu0 %v2349_v47  ;;  %754 = vmatpush.msra.mxu1 %v2307_v38  ;;  %v2479_v47 = vperm.slane %v371_v49, 2 }
  0x98   : > { %770 = vmatpush.msra.mxu2 %v2258_v27 }
  0x99   : > { %678 = vmatpush.msra.mxu0 %v2356_v48  ;;  %755 = vmatpush.msra.mxu1 %v2320_v41 }
  0x9a   : > { %771 = vmatpush.msra.mxu2 %v2271_v30 }
  0x9c   : > { %772 = vmatpush.msra.mxu2 %v2284_v33 }
  0x9e   : > { %773 = vmatpush.msra.mxu2 %v2297_v36 }
  0xa0   : > { %774 = vmatpush.msra.mxu2 %v2310_v39 }
  0xa2   : > { %775 = vmatpush.msra.mxu2 %v2323_v42 }
  0xd7   : > { %v404_v53 = vpop.f32.mrf.mxu0  ;;  %v424_v55 = vpop.f32.mrf.mxu1 }
  0xd8   : > { %v405_v56 = vadd.f32 %v404_v53, %v2471_v50  ;;  %v425_v57 = vadd.f32 %v424_v55, %v2473_v51 }
  0xda   : > { %v447_v58 = vadd.f32 %v405_v56, %v377_v52  ;;  %v467_v59 = vadd.f32 %v425_v57, %v378_v54 }
  0xdc   : > { %v1540_v60 = vmul.f32 -1.442695, %v447_v58  ;;  %v1541_v61 = vmul.f32 -1.442695, %v467_v59 }
  0xde   : > { %1688 = vpow2.f32 %v1540_v60 }
  0xdf   : > { %1690 = vpow2.f32 %v1541_v61 }
  0xe4   : > { %v1689_v62 = vpop.eup %1688 }
  0xe5   : > { %v1691_v63 = vpop.eup %1690  ;;  %v451_v44 = vadd.f32 1.0, %v1689_v62  ;;  %v444_v52 = vpop.f32.mrf.mxu2 }
  0xe6   : > { %v471_v42 = vadd.f32 1.0, %v1691_v63  ;;  %v445_v59 = vadd.f32 %v444_v52, %v2479_v47 }
  0xe7   : > { %1692 = vrcp.f32 %v451_v44  ;;  %v463_v54 = vand.u32 2147483648, %v451_v44  ;;  %v461_v57 = vand.u32 2147483647, %v451_v44  ;;  %vm457_vm1 = vweird.f32 %v451_v44 }
  0xe8   : > { %1694 = vrcp.f32 %v471_v42  ;;  %vm477_vm4 = vweird.f32 %v471_v42  ;;  %v483_v63 = vand.u32 2147483648, %v471_v42  ;;  %v481_v50 = vand.u32 2147483647, %v471_v42 }
  0xe9   : > { %v464_v61 = vor.u32 1.1754944e-38, %v463_v54  ;;  %vm462_vm3 = vcmp.eq.f32.partialorder %v461_v57, 8.507059e+37 }
  0xea   : > { %v484_v52 = vor.u32 1.1754944e-38, %v483_v63  ;;  %vm482_vm7 = vcmp.eq.f32.partialorder %v481_v50, 8.507059e+37  ;;  %v3016_v50 = vld [vmem:[#allocation21_spill] sm:$0xff] }
  0xed   : > { %v1693_v41 = vpop.eup %1692 }
  0xee   : > { %v1695_v48 = vpop.eup %1694  ;;  %v453_v39 = vmul.f32 %v1693_v41, %v451_v44  ;;  %vm458_vm0 = vweird.f32 %v1693_v41 }
  0xef   : > { %v473_v38 = vmul.f32 %v1695_v48, %v471_v42  ;;  %vm459_vm2 = vmor %vm457_vm1, %vm458_vm0  ;;  %vm478_vm5 = vweird.f32 %v1695_v48  ;;  %v3014_v42 = vld [vmem:[#allocation24_spill] sm:$0xff] }
  0xf0   : > { %v454_v53 = vsub.f32 1.0, %v453_v39  ;;  %vm479_vm6 = vmor %vm477_vm4, %vm478_vm5 }
  0xf1   : > { %v474_v55 = vsub.f32 1.0, %v473_v38  ;;  %v379_v38 = vld [vmem:[%s2469_s29 + $0x10] sm:$0xff]  ;;  %s1576_s29 = smul.u32 4294967272, %s1984_s15 }
  0xf2   : > { %v455_v56 = vmul.f32 %v1693_v41, %v454_v53 }
  0xf3   : > { %v475_v58 = vmul.f32 %v1695_v48, %v474_v55  ;;  %s1450_s19 = scalar_lea.vmem %s2485_s22, %s1576_s29 [#allocation9] }
  0xf4   : > { %v456_v60 = vadd.f32 %v1693_v41, %v455_v56 }
  0xf5   : > { %v476_v49 = vadd.f32 %v1695_v48, %v475_v58 }
  0xf6   : > { %v460_v62 = vsel %vm459_vm2, %v1693_v41, %v456_v60  ;;  %v3019_v60 = vld [vmem:[#allocation23_spill] sm:$0xff] }
  0xf7   : > { %v465_v39 = vsel %vm462_vm3, %v464_v61, %v460_v62  ;;  %v480_v51 = vsel %vm479_vm6, %v1695_v48, %v476_v49  ;;  %v3015_v48 = vld [vmem:[#allocation20_spill] sm:$0xff] }
  0xf8   : > { %v487_v53 = vmul.f32 %v465_v39, %v445_v59  ;;  %v485_v44 = vsel %vm482_vm7, %v484_v52, %v480_v51  ;;  %v3017_v51 = vld [vmem:[#allocation25_spill] sm:$0xff]  ;;  %v3018_v59 = vld [vmem:[#allocation22_spill] sm:$0xff]  ;;  %v1545_v61 = vld [vmem:[%s2544_s5 + $0x20] sm:$0xff] }
  0xf9   : > { %v491_v41 = vsub.f32 1.0, %v485_v44  ;;  %v490_v57 = vmul.f32 0.0, %v485_v44  ;;  %v3021_v52 = vld [vmem:[#allocation26_spill] sm:$0xff] }
  0xfa   : > { %v488_v55 = vadd.f32 %v487_v53, %v379_v38  ;;  %v3020_v38 = vld [vmem:[#allocation27_spill] sm:$0xff] }
  0xfb   : > { %v1544_v53 = vld [vmem:[%s2544_s5 + $0x18] sm:$0xff] }
  0xfc   : > { %1696 = vtanh.f32 %v488_v55 }
 0x102   : > { %v1697_v54 = vpop.eup %1696 }
 0x103   : > { %v492_v56 = vmul.f32 %v1697_v54, %v491_v41 }
 0x105   : > { %v2488_v58 = vadd.f32 %v492_v56, %v490_v57 }
 0x107   : > { %496 = vst [vmem:[%s495_s23] sm:$0xff] %v2488_v58  ;;  %521 = vmatmul.f32.vlgmr.msra.gmra.mxu3 %v2488_v58  ;;  %541 = vmatmul.f32.vlgmr.msrb.gmra.mxu0 %v2488_v58  ;;  %s2895_s23 = scalar_lea.vmem %s2132_s28, %s1578_s21 [#allocation3] }
 0x108   : > { %561 = vmatmul.f32.vlgmr.msrb.gmra.mxu1 %v2488_v58  ;;  %780 = vmatpush.msra.mxu3 %v2194_v12 }
 0x109   : > { %857 = vmatpush.msrb.mxu0 %v2147_v0  ;;  %877 = vmatpush.msrb.mxu1 %v2150_v1 }
 0x10a   : > { %781 = vmatpush.msra.mxu3 %v2200_v13 }
 0x10b   : > { %858 = vmatpush.msrb.mxu0 %v2153_v2  ;;  %878 = vmatpush.msrb.mxu1 %v2158_v3 }
 0x10c   : > { %782 = vmatpush.msra.mxu3 %v2213_v16 }
 0x10d   : > { %859 = vmatpush.msrb.mxu0 %v2161_v4  ;;  %879 = vmatpush.msrb.mxu1 %v2164_v5 }
 0x10e   : > { %783 = vmatpush.msra.mxu3 %v2226_v19 }
 0x10f   : > { %860 = vmatpush.msrb.mxu0 %v2170_v6  ;;  %880 = vmatpush.msrb.mxu1 %v2173_v7 }
 0x110   : > { %784 = vmatpush.msra.mxu3 %v2239_v22 }
 0x111   : > { %861 = vmatpush.msrb.mxu0 %v2179_v8  ;;  %881 = vmatpush.msrb.mxu1 %v2182_v9 }
 0x112   : > { %785 = vmatpush.msra.mxu3 %v2252_v25 }
 0x113   : > { %862 = vmatpush.msrb.mxu0 %v2188_v10  ;;  %882 = vmatpush.msrb.mxu1 %v2191_v11 }
 0x114   : > { %786 = vmatpush.msra.mxu3 %v2265_v28 }
 0x115   : > { %863 = vmatpush.msrb.mxu0 %v2203_v14  ;;  %883 = vmatpush.msrb.mxu1 %v2206_v15 }
 0x116   : > { %787 = vmatpush.msra.mxu3 %v2278_v31 }
 0x117   : > { %864 = vmatpush.msrb.mxu0 %v2216_v17  ;;  %884 = vmatpush.msrb.mxu1 %v2219_v18 }
 0x118   : > { %788 = vmatpush.msra.mxu3 %v2291_v34 }
 0x119   : > { %865 = vmatpush.msrb.mxu0 %v2229_v20  ;;  %885 = vmatpush.msrb.mxu1 %v2232_v21 }
 0x11a   : > { %789 = vmatpush.msra.mxu3 %v2304_v37 }
 0x11b   : > { %866 = vmatpush.msrb.mxu0 %v2242_v23  ;;  %886 = vmatpush.msrb.mxu1 %v2245_v24 }
 0x11c   : > { %790 = vmatpush.msra.mxu3 %v2317_v40 }
 0x11d   : > { %867 = vmatpush.msrb.mxu0 %v2255_v26  ;;  %887 = vmatpush.msrb.mxu1 %v2258_v27 }
 0x11e   : > { %791 = vmatpush.msra.mxu3 %v2331_v43 }
 0x11f   : > { %868 = vmatpush.msrb.mxu0 %v2268_v29  ;;  %888 = vmatpush.msrb.mxu1 %v2271_v30 }
 0x120   : > { %792 = vmatpush.msra.mxu3 %v2337_v45 }
 0x121   : > { %869 = vmatpush.msrb.mxu0 %v2281_v32  ;;  %889 = vmatpush.msrb.mxu1 %v2284_v33 }
 0x122   : > { %793 = vmatpush.msra.mxu3 %v2342_v46 }
 0x123   : > { %870 = vmatpush.msrb.mxu0 %v2294_v35  ;;  %890 = vmatpush.msrb.mxu1 %v2297_v36 }
 0x124   : > { %794 = vmatpush.msra.mxu3 %v3014_v42 }
 0x125   : > { %871 = vmatpush.msrb.mxu0 %v3015_v48  ;;  %891 = vmatpush.msrb.mxu1 %v3016_v50 }
 0x126   : > { %795 = vmatpush.msra.mxu3 %v3017_v51 }
 0x127   : > { %872 = vmatpush.msrb.mxu0 %v3018_v59  ;;  %892 = vmatpush.msrb.mxu1 %v3019_v60 }
 0x184   : > { %v542_v62 = vpop.f32.mrf.mxu0 }
 0x185   : > { %v543_v39 = vadd.f32 %v542_v62, %v3020_v38  ;;  %v1546_v38 = vld [vmem:[%s2544_s5 + $0x28] sm:$0xff]  ;;  %s1458_s5 = scalar_lea.vmem %s2485_s22, %s1584_s6 [#allocation9] }
 0x187   : > { %v585_v49 = vadd.f32 %v1545_v61, %v543_v39 }
 0x189   : > { %v1548_v63 = vmul.f32 -1.442695, %v585_v49 }
 0x18a   : > { %v522_v55 = vpop.f32.mrf.mxu3 }
 0x18b   : > { %1698 = vpow2.f32 %v1548_v63  ;;  %v523_v44 = vadd.f32 %v522_v55, %v3021_v52 }
 0x18d   : > { %v565_v41 = vadd.f32 %v1544_v53, %v523_v44  ;;  %v562_v44 = vpop.f32.mrf.mxu1 }
 0x18f   : > { %v1547_v54 = vmul.f32 -1.442695, %v565_v41 }
 0x191   : > { %v1699_v56 = vpop.eup %1698  ;;  %1700 = vpow2.f32 %v1547_v54 }
 0x192   : > { %v589_v57 = vadd.f32 1.0, %v1699_v56 }
 0x194   : > { %1702 = vrcp.f32 %v589_v57  ;;  %vm595_vm13 = vweird.f32 %v589_v57  ;;  %v599_v42 = vand.u32 2147483647, %v589_v57 }
 0x196   : > { %vm600_vm15 = vcmp.eq.f32.partialorder %v599_v42, 8.507059e+37 }
 0x197   : > { %v1701_v60 = vpop.eup %1700 }
 0x198   : > { %v569_v59 = vadd.f32 1.0, %v1701_v60  ;;  %v563_v60 = vadd.f32 %v562_v44, %v2479_v47 }
 0x19a   : > { %1704 = vrcp.f32 %v569_v59  ;;  %v1703_v51 = vpop.eup %1702  ;;  %v581_v49 = vand.u32 2147483648, %v569_v59  ;;  %v579_v55 = vand.u32 2147483647, %v569_v59  ;;  %vm575_vm9 = vweird.f32 %v569_v59 }
 0x19b   : > { %v591_v50 = vmul.f32 %v1703_v51, %v589_v57  ;;  %vm596_vm12 = vweird.f32 %v1703_v51 }
 0x19c   : > { %v582_v54 = vor.u32 1.1754944e-38, %v581_v49  ;;  %vm580_vm11 = vcmp.eq.f32.partialorder %v579_v55, 8.507059e+37  ;;  %vm597_vm14 = vmor %vm595_vm13, %vm596_vm12 }
 0x19d   : > { %v592_v61 = vsub.f32 1.0, %v591_v50 }
 0x19f   : > { %v593_v53 = vmul.f32 %v1703_v51, %v592_v61 }
 0x1a0   : > { %v1705_v48 = vpop.eup %1704 }
 0x1a1   : > { %v571_v62 = vmul.f32 %v1705_v48, %v569_v59  ;;  %vm576_vm8 = vweird.f32 %v1705_v48  ;;  %v594_v50 = vadd.f32 %v1703_v51, %v593_v53 }
 0x1a2   : > { %vm577_vm10 = vmor %vm575_vm9, %vm576_vm8 }
 0x1a3   : > { %v572_v39 = vsub.f32 1.0, %v571_v62  ;;  %v601_v62 = vand.u32 2147483648, %v589_v57 }
 0x1a5   : > { %v573_v63 = vmul.f32 %v1705_v48, %v572_v39  ;;  %v602_v59 = vor.u32 1.1754944e-38, %v601_v62 }
 0x1a7   : > { %v574_v41 = vadd.f32 %v1705_v48, %v573_v63  ;;  %v598_v63 = vsel %vm597_vm14, %v1703_v51, %v594_v50 }
 0x1a8   : > { %v603_v49 = vsel %vm600_vm15, %v602_v59, %v598_v63 }
 0x1a9   : > { %v578_v56 = vsel %vm577_vm10, %v1705_v48, %v574_v41  ;;  %v609_v48 = vsub.f32 1.0, %v603_v49  ;;  %v608_v44 = vmul.f32 %v603_v49, %v2488_v58 }
 0x1aa   : > { %v583_v52 = vsel %vm580_vm11, %v582_v54, %v578_v56 }
 0x1ab   : > { %v605_v39 = vmul.f32 %v583_v52, %v563_v60 }
 0x1ad   : > { %v606_v61 = vadd.f32 %v1546_v38, %v605_v39 }
 0x1af   : > { %1706 = vtanh.f32 %v606_v61 }
 0x1b5   : > { %v1707_v55 = vpop.eup %1706 }
 0x1b6   : > { %v610_v41 = vmul.f32 %v1707_v55, %v609_v48 }
 0x1b8   : > { %v2555_v53 = vadd.f32 %v610_v41, %v608_v44 }
 0x1ba   : > { %1550 = vst [vmem:[%s1424_s7 + $0x8] sm:$0xff] %v2555_v53  ;;  %639 = vmatmul.f32.vlgmr.msrb.gmra.mxu2 %v2555_v53  ;;  %659 = vmatmul.f32.vlgmr.msrb.gmra.mxu3 %v2555_v53  ;;  %s2913_s7 = scalar_lea.vmem %s2132_s28, %s1586_s4 [#allocation3]  ;;  %s1601_s28 = sshll.u32 %s1984_s15, 6 }
 0x1bb   : > { %679 = vmatmul.f32.vlgmr.msra.gmra.mxu0 %v2555_v53  ;;  %897 = vmatpush.msrb.mxu2 %v2194_v12  ;;  %s1340_s30 = scalar_lea.hbm %s2966_s3, %s1601_s28 }
 0x1bc   : > { %975 = vmatpush.msrb.mxu3 %v2147_v0  ;;  %995 = vmatpush.msra.mxu0 %v2150_v1  ;;  %v3022_v0 = vld [vmem:[#allocation24_spill] sm:$0xff] }
 0x1bd   : > { %898 = vmatpush.msrb.mxu2 %v2200_v13  ;;  %v3023_v1 = vld [vmem:[#allocation20_spill] sm:$0xff] }
 0x1be   : > { %976 = vmatpush.msrb.mxu3 %v2153_v2  ;;  %996 = vmatpush.msra.mxu0 %v2158_v3  ;;  %v3024_v2 = vld [vmem:[#allocation21_spill] sm:$0xff] }
 0x1bf   : > { %899 = vmatpush.msrb.mxu2 %v2213_v16  ;;  %v3025_v3 = vld [vmem:[#allocation25_spill] sm:$0xff] }
 0x1c0   : > { %977 = vmatpush.msrb.mxu3 %v2161_v4  ;;  %997 = vmatpush.msra.mxu0 %v2164_v5  ;;  %v3026_v4 = vld [vmem:[#allocation22_spill] sm:$0xff]  ;;  %v3027_v5 = vld [vmem:[#allocation23_spill] sm:$0xff] }
 0x1c1   : > { %900 = vmatpush.msrb.mxu2 %v2226_v19 }
 0x1c2   : > { %978 = vmatpush.msrb.mxu3 %v2170_v6  ;;  %998 = vmatpush.msra.mxu0 %v2173_v7  ;;  %v1552_v6 = vld [vmem:[%s2611_s9 + $0x30] sm:$0xff] }
 0x1c3   : > { %901 = vmatpush.msrb.mxu2 %v2239_v22 }
 0x1c4   : > { %979 = vmatpush.msrb.mxu3 %v2179_v8  ;;  %999 = vmatpush.msra.mxu0 %v2182_v9  ;;  %v1553_v8 = vld [vmem:[%s2611_s9 + $0x38] sm:$0xff] }
 0x1c5   : > { %902 = vmatpush.msrb.mxu2 %v2252_v25 }
 0x1c6   : > { %980 = vmatpush.msrb.mxu3 %v2188_v10  ;;  %1000 = vmatpush.msra.mxu0 %v2191_v11  ;;  %v3028_v10 = vld [vmem:[#allocation26_spill] sm:$0xff] }
 0x1c7   : > { %903 = vmatpush.msrb.mxu2 %v2265_v28 }
 0x1c8   : > { %981 = vmatpush.msrb.mxu3 %v2203_v14  ;;  %1001 = vmatpush.msra.mxu0 %v2206_v15  ;;  %v3029_v14 = vld [vmem:[#allocation27_spill] sm:$0xff] }
 0x1c9   : > { %904 = vmatpush.msrb.mxu2 %v2278_v31 }
 0x1ca   : > { %982 = vmatpush.msrb.mxu3 %v2216_v17  ;;  %1002 = vmatpush.msra.mxu0 %v2219_v18 }
 0x1cb   : > { %905 = vmatpush.msrb.mxu2 %v2291_v34 }
 0x1cc   : > { %983 = vmatpush.msrb.mxu3 %v2229_v20  ;;  %1003 = vmatpush.msra.mxu0 %v2232_v21 }
 0x1cd   : > { %906 = vmatpush.msrb.mxu2 %v2304_v37 }
 0x1ce   : > { %984 = vmatpush.msrb.mxu3 %v2242_v23  ;;  %1004 = vmatpush.msra.mxu0 %v2245_v24 }
 0x1cf   : > { %907 = vmatpush.msrb.mxu2 %v2317_v40 }
 0x1d0   : > { %985 = vmatpush.msrb.mxu3 %v2255_v26  ;;  %1005 = vmatpush.msra.mxu0 %v2258_v27 }
 0x1d1   : > { %908 = vmatpush.msrb.mxu2 %v2331_v43 }
 0x1d2   : > { %986 = vmatpush.msrb.mxu3 %v2268_v29  ;;  %1006 = vmatpush.msra.mxu0 %v2271_v30 }
 0x1d3   : > { %909 = vmatpush.msrb.mxu2 %v2337_v45 }
 0x1d4   : > { %987 = vmatpush.msrb.mxu3 %v2281_v32  ;;  %1007 = vmatpush.msra.mxu0 %v2284_v33 }
 0x1d5   : > { %910 = vmatpush.msrb.mxu2 %v2342_v46 }
 0x1d6   : > { %988 = vmatpush.msrb.mxu3 %v2294_v35  ;;  %1008 = vmatpush.msra.mxu0 %v2297_v36 }
 0x1d7   : > { %911 = vmatpush.msrb.mxu2 %v3022_v0 }
 0x1d8   : > { %989 = vmatpush.msrb.mxu3 %v3023_v1  ;;  %1009 = vmatpush.msra.mxu0 %v3024_v2 }
 0x1d9   : > { %912 = vmatpush.msrb.mxu2 %v3025_v3 }
 0x1da   : > { %990 = vmatpush.msrb.mxu3 %v3026_v4  ;;  %1010 = vmatpush.msra.mxu0 %v3027_v5 }
 0x238   : > { %v680_v49 = vpop.f32.mrf.mxu0 }
 0x239   : > { %v681_v41 = vadd.f32 %v680_v49, %v2479_v47  ;;  %v2690_v49 = vld [vmem:[%s2140_s25 + $0xe0] sm:$0xff] }
 0x23d   : > { %v640_v7 = vpop.f32.mrf.mxu2  ;;  %v660_v9 = vpop.f32.mrf.mxu3 }
 0x23e   : > { %v641_v11 = vadd.f32 %v640_v7, %v3028_v10  ;;  %v661_v15 = vadd.f32 %v660_v9, %v3029_v14  ;;  %v1554_v7 = vld [vmem:[%s2611_s9 + $0x40] sm:$0xff] }
 0x240   : > { %v683_v17 = vadd.f32 %v1552_v6, %v641_v11  ;;  %v703_v18 = vadd.f32 %v1553_v8, %v661_v15 }
 0x242   : > { %v1555_v58 = vmul.f32 -1.442695, %v683_v17  ;;  %v1556_v42 = vmul.f32 -1.442695, %v703_v18 }
 0x244   : > { %1708 = vpow2.f32 %v1555_v58 }
 0x245   : > { %1710 = vpow2.f32 %v1556_v42 }
 0x24a   : > { %v1709_v51 = vpop.eup %1708 }
 0x24b   : > { %v1711_v38 = vpop.eup %1710  ;;  %v687_v52 = vadd.f32 1.0, %v1709_v51 }
 0x24c   : > { %v707_v57 = vadd.f32 1.0, %v1711_v38 }
 0x24d   : > { %1712 = vrcp.f32 %v687_v52  ;;  %v699_v39 = vand.u32 2147483648, %v687_v52  ;;  %v697_v59 = vand.u32 2147483647, %v687_v52  ;;  %vm693_vm1 = vweird.f32 %v687_v52 }
 0x24e   : > { %1714 = vrcp.f32 %v707_v57  ;;  %v719_v15 = vand.u32 2147483648, %v707_v57  ;;  %vm713_vm5 = vweird.f32 %v707_v57  ;;  %v717_v17 = vand.u32 2147483647, %v707_v57 }
 0x24f   : > { %v700_v44 = vor.u32 1.1754944e-38, %v699_v39  ;;  %vm698_vm3 = vcmp.eq.f32.partialorder %v697_v59, 8.507059e+37  ;;  %v2654_v39 = vld [vmem:[%s2140_s25 + $0x140] sm:$0xff]  ;;  %v2681_v59 = vld [vmem:[%s2140_s25 + $0xf8] sm:$0xff] }
 0x250   : > { %v720_v42 = vor.u32 1.1754944e-38, %v719_v15  ;;  %vm718_vm7 = vcmp.eq.f32.partialorder %v717_v17, 8.507059e+37 }
 0x253   : > { %v1713_v54 = vpop.eup %1712 }
 0x254   : > { %v1715_v60 = vpop.eup %1714  ;;  %v689_v56 = vmul.f32 %v1713_v54, %v687_v52  ;;  %vm694_vm0 = vweird.f32 %v1713_v54 }
 0x255   : > { %v709_v50 = vmul.f32 %v1715_v60, %v707_v57  ;;  %vm695_vm2 = vmor %vm693_vm1, %vm694_vm0  ;;  %vm714_vm4 = vweird.f32 %v1715_v60 }
 0x256   : > { %v690_v62 = vsub.f32 1.0, %v689_v56  ;;  %vm715_vm6 = vmor %vm713_vm5, %vm714_vm4 }
 0x257   : > { %v710_v61 = vsub.f32 1.0, %v709_v50  ;;  %v2641_v50 = vld [vmem:[%s2140_s25 + $0x150] sm:$0xff] }
 0x258   : > { %v691_v63 = vmul.f32 %v1713_v54, %v690_v62  ;;  %v2645_v62 = vld [vmem:[%s2140_s25 + $0x158] sm:$0xff] }
 0x259   : > { %v711_v48 = vmul.f32 %v1715_v60, %v710_v61  ;;  %v2663_v61 = vld [vmem:[%s2140_s25 + $0x128] sm:$0xff] }
 0x25a   : > { %v692_v55 = vadd.f32 %v1713_v54, %v691_v63  ;;  %v2672_v63 = vld [vmem:[%s2140_s25 + $0x110] sm:$0xff] }
 0x25b   : > { %v712_v9 = vadd.f32 %v1715_v60, %v711_v48  ;;  %v2699_v48 = vld [vmem:[%s2140_s25 + $0xc8] sm:$0xff] }
 0x25c   : > { %v696_v6 = vsel %vm695_vm2, %v1713_v54, %v692_v55 }
 0x25d   : > { %v701_v8 = vsel %vm698_vm3, %v700_v44, %v696_v6  ;;  %v716_v58 = vsel %vm715_vm6, %v1715_v60, %v712_v9  ;;  %v2636_v60 = vld [vmem:[%s2140_s25 + $0x170] sm:$0xff] }
 0x25e   : > { %v723_v11 = vmul.f32 %v701_v8, %v681_v41  ;;  %v721_v51 = vsel %vm718_vm7, %v720_v42, %v716_v58  ;;  %v1561_v41 = vld [vmem:[%s2729_s11 + $0x58] sm:$0xff] }
 0x25f   : > { %v727_v38 = vsub.f32 1.0, %v721_v51  ;;  %v726_v54 = vmul.f32 %v721_v51, %v2555_v53  ;;  %v2632_v53 = vld [vmem:[%s2140_s25 + $0x168] sm:$0xff] }
 0x260   : > { %v724_v18 = vadd.f32 %v1554_v7, %v723_v11 }
 0x262   : > { %1716 = vtanh.f32 %v724_v18 }
 0x268   : > { %v1717_v52 = vpop.eup %1716 }
 0x269   : > { %v728_v56 = vmul.f32 %v1717_v52, %v727_v38 }
 0x26b   : > { %v2624_v57 = vadd.f32 %v728_v56, %v726_v54 }
 0x26d   : > { %756 = vmatmul.f32.vlgmr.msra.gmra.mxu1 %v2624_v57  ;;  %776 = vmatmul.f32.vlgmr.msra.gmra.mxu2 %v2624_v57  ;;  %1558 = vst [vmem:[%s1432_s10 + $0x10] sm:$0xff] %v2624_v57  ;;  %s1592_s10 = smul.u32 4294967240, %s1984_s15 }
 0x26e   : > { %796 = vmatmul.f32.vlgmr.msra.gmra.mxu3 %v2624_v57  ;;  %1015 = vmatpush.msra.mxu1 %v2194_v12  ;;  %v2650_v12 = vld [vmem:[%s2140_s25 + $0x138] sm:$0xff] }
 0x26f   : > { %1093 = vmatpush.msra.mxu2 %v2632_v53  ;;  %1113 = vmatpush.msra.mxu3 %v2636_v60 }
 0x270   : > { %1016 = vmatpush.msra.mxu1 %v2200_v13  ;;  %v2659_v13 = vld [vmem:[%s2140_s25 + $0x120] sm:$0xff] }
 0x271   : > { %1094 = vmatpush.msra.mxu2 %v2641_v50  ;;  %1114 = vmatpush.msra.mxu3 %v2645_v62 }
 0x272   : > { %1017 = vmatpush.msra.mxu1 %v2213_v16  ;;  %v2668_v16 = vld [vmem:[%s2140_s25 + $0x108] sm:$0xff] }
 0x273   : > { %1095 = vmatpush.msra.mxu2 %v2650_v12  ;;  %1115 = vmatpush.msra.mxu3 %v2654_v39 }
 0x274   : > { %1018 = vmatpush.msra.mxu1 %v2226_v19  ;;  %v2677_v19 = vld [vmem:[%s2140_s25 + $0xf0] sm:$0xff] }
 0x275   : > { %1096 = vmatpush.msra.mxu2 %v2659_v13  ;;  %1116 = vmatpush.msra.mxu3 %v2663_v61 }
 0x276   : > { %1019 = vmatpush.msra.mxu1 %v2239_v22  ;;  %v2686_v22 = vld [vmem:[%s2140_s25 + $0xd8] sm:$0xff] }
 0x277   : > { %1097 = vmatpush.msra.mxu2 %v2668_v16  ;;  %1117 = vmatpush.msra.mxu3 %v2672_v63 }
 0x278   : > { %1020 = vmatpush.msra.mxu1 %v2252_v25  ;;  %v2695_v25 = vld [vmem:[%s2140_s25 + $0xc0] sm:$0xff] }
 0x279   : > { %1098 = vmatpush.msra.mxu2 %v2677_v19  ;;  %1118 = vmatpush.msra.mxu3 %v2681_v59 }
 0x27a   : > { %1021 = vmatpush.msra.mxu1 %v2265_v28 }
 0x27b   : > { %1099 = vmatpush.msra.mxu2 %v2686_v22  ;;  %1119 = vmatpush.msra.mxu3 %v2690_v49 }
 0x27c   : > { %1022 = vmatpush.msra.mxu1 %v2278_v31 }
 0x27d   : > { %1100 = vmatpush.msra.mxu2 %v2695_v25  ;;  %1120 = vmatpush.msra.mxu3 %v2699_v48 }
 0x27e   : > { %1023 = vmatpush.msra.mxu1 %v2291_v34 }
 0x27f   : > { %1101 = vmatpush.msra.mxu2 %v2229_v20  ;;  %1121 = vmatpush.msra.mxu3 %v2232_v21  ;;  %v1559_v20 = vld [vmem:[%s2729_s11 + $0x48] sm:$0xff] }
 0x280   : > { %1024 = vmatpush.msra.mxu1 %v2304_v37 }
 0x281   : > { %1102 = vmatpush.msra.mxu2 %v2242_v23  ;;  %1122 = vmatpush.msra.mxu3 %v2245_v24 }
 0x282   : > { %1025 = vmatpush.msra.mxu1 %v2317_v40 }
 0x283   : > { %1103 = vmatpush.msra.mxu2 %v2255_v26  ;;  %1123 = vmatpush.msra.mxu3 %v2258_v27  ;;  %v1560_v27 = vld [vmem:[%s2729_s11 + $0x50] sm:$0xff] }
 0x284   : > { %1026 = vmatpush.msra.mxu1 %v2331_v43 }
 0x285   : > { %1104 = vmatpush.msra.mxu2 %v2268_v29  ;;  %1124 = vmatpush.msra.mxu3 %v2271_v30 }
 0x286   : > { %1027 = vmatpush.msra.mxu1 %v2337_v45 }
 0x287   : > { %1105 = vmatpush.msra.mxu2 %v2281_v32  ;;  %1125 = vmatpush.msra.mxu3 %v2284_v33 }
 0x288   : > { %1028 = vmatpush.msra.mxu1 %v2342_v46 }
 0x289   : > { %1106 = vmatpush.msra.mxu2 %v2294_v35  ;;  %1126 = vmatpush.msra.mxu3 %v2297_v36 }
 0x28a   : > { %1029 = vmatpush.msra.mxu1 %v3022_v0 }
 0x28b   : > { %1107 = vmatpush.msra.mxu2 %v3023_v1  ;;  %1127 = vmatpush.msra.mxu3 %v3024_v2 }
 0x28c   : > { %1030 = vmatpush.msra.mxu1 %v3025_v3 }
 0x28d   : > { %1108 = vmatpush.msra.mxu2 %v3026_v4  ;;  %1128 = vmatpush.msra.mxu3 %v3027_v5 }
 0x2ea   : > { %v757_v21 = vpop.f32.mrf.mxu1 }
 0x2eb   : > { %v758_v23 = vadd.f32 %v757_v21, %v3028_v10  ;;  %v2759_v21 = vld [vmem:[%s2140_s25 + $0x148] sm:$0xff] }
 0x2ed   : > { %v800_v24 = vadd.f32 %v1559_v20, %v758_v23  ;;  %v2747_v20 = vld [vmem:[%s2140_s25 + $0x178] sm:$0xff]  ;;  %v1803_v23 = vld [vmem:[%s2140_s25 + $0x68] sm:$0xff] }
 0x2ef   : > { %v1562_v26 = vmul.f32 -1.442695, %v800_v24  ;;  %v2819_v24 = vld [vmem:[%s2140_s25 + $0x58] sm:$0xff] }
 0x2f0   : > { %v777_v28 = vpop.f32.mrf.mxu2 }
 0x2f1   : > { %1718 = vpow2.f32 %v1562_v26  ;;  %v778_v29 = vadd.f32 %v777_v28, %v3029_v14  ;;  %v797_v1 = vpop.f32.mrf.mxu3  ;;  %v1805_v26 = vld [vmem:[%s2140_s25 + $0x48] sm:$0xff]  ;;  %v2825_v28 = vld [vmem:[%s2140_s25 + $0x40] sm:$0xff] }
 0x2f2   : > { %v798_v55 = vadd.f32 %v797_v1, %v2479_v47 }
 0x2f3   : > { %v820_v30 = vadd.f32 %v1560_v27, %v778_v29  ;;  %v1806_v27 = vld [vmem:[%s2140_s25 + $0x50] sm:$0xff] }
 0x2f4   : > { %v1808_v29 = vld [vmem:[%s2140_s25 + $0x30] sm:$0xff] }
 0x2f5   : > { %v1563_v31 = vmul.f32 -1.442695, %v820_v30  ;;  %v1809_v30 = vld [vmem:[%s2140_s25 + $0x38] sm:$0xff] }
 0x2f7   : > { %v1719_v32 = vpop.eup %1718  ;;  %1720 = vpow2.f32 %v1563_v31  ;;  %v2831_v31 = vld [vmem:[%s2140_s25 + $0x28] sm:$0xff] }
 0x2f8   : > { %v804_v33 = vadd.f32 1.0, %v1719_v32  ;;  %v1811_v32 = vld [vmem:[%s2140_s25 + $0x18] sm:$0xff] }
 0x2fa   : > { %1722 = vrcp.f32 %v804_v33  ;;  %v816_v43 = vand.u32 2147483648, %v804_v33  ;;  %v814_v46 = vand.u32 2147483647, %v804_v33  ;;  %vm810_vm9 = vweird.f32 %v804_v33 }
 0x2fc   : > { %v817_v4 = vor.u32 1.1754944e-38, %v816_v43  ;;  %vm815_vm11 = vcmp.eq.f32.partialorder %v814_v46, 8.507059e+37  ;;  %v855_v43 = vld [vmem:[%s2846_s17 + $0x8] sm:$0xff] }
 0x2fd   : > { %v1721_v34 = vpop.eup %1720 }
 0x2fe   : > { %v824_v35 = vadd.f32 1.0, %v1721_v34  ;;  %v2837_v34 = vld [vmem:[%s2140_s25 + $0x10] sm:$0xff] }
 0x300   : > { %v1723_v36 = vpop.eup %1722  ;;  %1724 = vrcp.f32 %v824_v35  ;;  %v836_v8 = vand.u32 2147483648, %v824_v35  ;;  %v834_v11 = vand.u32 2147483647, %v824_v35  ;;  %vm830_vm13 = vweird.f32 %v824_v35 }
 0x301   : > { %v806_v37 = vmul.f32 %v1723_v36, %v804_v33  ;;  %vm811_vm8 = vweird.f32 %v1723_v36  ;;  %v1812_v33 = vld [vmem:[%s2140_s25 + $0x20] sm:$0xff] }
 0x302   : > { %vm812_vm10 = vmor %vm810_vm9, %vm811_vm8  ;;  %v837_v18 = vor.u32 1.1754944e-38, %v836_v8  ;;  %vm835_vm15 = vcmp.eq.f32.partialorder %v834_v11, 8.507059e+37 }
 0x303   : > { %v807_v40 = vsub.f32 1.0, %v806_v37  ;;  %v854_v37 = vld [vmem:[%s2846_s17] sm:$0xff] }
 0x305   : > { %v808_v45 = vmul.f32 %v1723_v36, %v807_v40 }
 0x306   : > { %v1725_v0 = vpop.eup %1724 }
 0x307   : > { %v826_v2 = vmul.f32 %v1725_v0, %v824_v35  ;;  %v809_v3 = vadd.f32 %v1723_v36, %v808_v45  ;;  %vm831_vm12 = vweird.f32 %v1725_v0  ;;  %v1814_v35 = vld [vmem:[%s2140_s25] sm:$0xff] }
 0x308   : > { %vm832_vm14 = vmor %vm830_vm13, %vm831_vm12 }
 0x309   : > { %v827_v5 = vsub.f32 1.0, %v826_v2  ;;  %v813_v44 = vsel %vm812_vm10, %v1723_v36, %v809_v3  ;;  %v1815_v36 = vld [vmem:[%s2140_s25 + $0x8] sm:$0xff] }
 0x30a   : > { %v818_v6 = vsel %vm815_vm11, %v817_v4, %v813_v44 }
 0x30b   : > { %v828_v7 = vmul.f32 %v1725_v0, %v827_v5  ;;  %v840_v9 = vmul.f32 %v818_v6, %v798_v55 }
 0x30d   : > { %v829_v15 = vadd.f32 %v1725_v0, %v828_v7  ;;  %v841_v17 = vadd.f32 %v1561_v41, %v840_v9 }
 0x30f   : > { %v833_v58 = vsel %vm832_vm14, %v1725_v0, %v829_v15  ;;  %1726 = vtanh.f32 %v841_v17 }
 0x310   : > { %v838_v42 = vsel %vm835_vm15, %v837_v18, %v833_v58 }
 0x311   : > { %v844_v51 = vsub.f32 1.0, %v838_v42  ;;  %v843_v54 = vmul.f32 %v838_v42, %v2624_v57  ;;  %v2753_v57 = vld [vmem:[%s2140_s25 + $0x160] sm:$0xff] }
 0x315   : > { %v1727_v38 = vpop.eup %1726 }
 0x316   : > { %v845_v52 = vmul.f32 %v1727_v38, %v844_v51 }
 0x318   : > { %v2740_v56 = vadd.f32 %v845_v52, %v843_v54 }
 0x31a   : > { %1565 = vst [vmem:[%s1438_s26 + $0x18] sm:$0xff] %v2740_v56  ;;  %873 = vmatmul.f32.vlgmr.msrb.gmra.mxu0 %v2740_v56  ;;  %893 = vmatmul.f32.vlgmr.msrb.gmra.mxu1 %v2740_v56  ;;  %s1343_s26 = sshll.u32 %s1340_s30, 4  ;;  %s1344_s26 = int_to_ptr.hbm [resolvable:$true] %s1343_s26 }
 0x31b   : > { %913 = vmatmul.f32.vlgmr.msrb.gmra.mxu2 %v2740_v56  ;;  %1133 = vmatpush.msrb.mxu0 %v2747_v20 }
 0x31c   : > { %1211 = vmatpush.msrb.mxu1 %v2632_v53  ;;  %1231 = vmatpush.msrb.mxu2 %v2636_v60  ;;  %v2765_v53 = vld [vmem:[%s2140_s25 + $0x130] sm:$0xff]  ;;  %v2771_v60 = vld [vmem:[%s2140_s25 + $0x118] sm:$0xff] }
 0x31d   : > { %1134 = vmatpush.msrb.mxu0 %v2753_v57 }
 0x31e   : > { %1212 = vmatpush.msrb.mxu1 %v2641_v50  ;;  %1232 = vmatpush.msrb.mxu2 %v2645_v62  ;;  %v2777_v50 = vld [vmem:[%s2140_s25 + $0x100] sm:$0xff]  ;;  %v2783_v62 = vld [vmem:[%s2140_s25 + $0xe8] sm:$0xff] }
 0x31f   : > { %1135 = vmatpush.msrb.mxu0 %v2759_v21 }
 0x320   : > { %1213 = vmatpush.msrb.mxu1 %v2650_v12  ;;  %1233 = vmatpush.msrb.mxu2 %v2654_v39  ;;  %v2789_v12 = vld [vmem:[%s2140_s25 + $0xd0] sm:$0xff]  ;;  %v2795_v39 = vld [vmem:[%s2140_s25 + $0xb8] sm:$0xff] }
 0x321   : > { %1136 = vmatpush.msrb.mxu0 %v2765_v53 }
 0x322   : > { %1214 = vmatpush.msrb.mxu1 %v2659_v13  ;;  %1234 = vmatpush.msrb.mxu2 %v2663_v61  ;;  %v1793_v13 = vld [vmem:[%s2140_s25 + $0xa8] sm:$0xff]  ;;  %v1794_v61 = vld [vmem:[%s2140_s25 + $0xb0] sm:$0xff] }
 0x323   : > { %1137 = vmatpush.msrb.mxu0 %v2771_v60 }
 0x324   : > { %1215 = vmatpush.msrb.mxu1 %v2668_v16  ;;  %1235 = vmatpush.msrb.mxu2 %v2672_v63  ;;  %v2801_v16 = vld [vmem:[%s2140_s25 + $0xa0] sm:$0xff]  ;;  %v1796_v63 = vld [vmem:[%s2140_s25 + $0x90] sm:$0xff] }
 0x325   : > { %1138 = vmatpush.msrb.mxu0 %v2777_v50 }
 0x326   : > { %1216 = vmatpush.msrb.mxu1 %v2677_v19  ;;  %1236 = vmatpush.msrb.mxu2 %v2681_v59  ;;  %v1797_v19 = vld [vmem:[%s2140_s25 + $0x98] sm:$0xff]  ;;  %v2807_v59 = vld [vmem:[%s2140_s25 + $0x88] sm:$0xff] }
 0x327   : > { %1139 = vmatpush.msrb.mxu0 %v2783_v62 }
 0x328   : > { %1217 = vmatpush.msrb.mxu1 %v2686_v22  ;;  %1237 = vmatpush.msrb.mxu2 %v2690_v49  ;;  %v1799_v22 = vld [vmem:[%s2140_s25 + $0x78] sm:$0xff]  ;;  %v1800_v49 = vld [vmem:[%s2140_s25 + $0x80] sm:$0xff] }
 0x329   : > { %1140 = vmatpush.msrb.mxu0 %v2789_v12 }
 0x32a   : > { %1218 = vmatpush.msrb.mxu1 %v2695_v25  ;;  %1238 = vmatpush.msrb.mxu2 %v2699_v48  ;;  %v2813_v25 = vld [vmem:[%s2140_s25 + $0x70] sm:$0xff]  ;;  %v1802_v48 = vld [vmem:[%s2140_s25 + $0x60] sm:$0xff]  ;;  %s1569_s25 = sshll.u32 %s850_s12, 3  ;;  %s1466_s12 = scalar_lea.vmem %s2485_s22, %s1592_s10 [#allocation9] }
 0x32b   : > { %1141 = vmatpush.msrb.mxu0 %v2795_v39  ;;  %s965_s18 = scalar_lea.vmem %s2485_s22, %s1569_s25 [#allocation9] }
 0x32c   : > { %1219 = vmatpush.msrb.mxu1 %v1793_v13  ;;  %1239 = vmatpush.msrb.mxu2 %v1794_v61  ;;  %v856_v61 = vld [vmem:[%s2846_s17 + $0x10] sm:$0xff]  ;;  %s1920_s17 = sshra.s32 %s1344_s26, 4  ;;  %s1921_s17 = int_to_ptr.hbm [resolvable:$true] %s1920_s17 }
 0x32d   : > { %1142 = vmatpush.msrb.mxu0 %v2801_v16  ;;  %s1922_s25 = scalar_lea.hbm %s1921_s17, 64  ;;  %p1927_p7 = scmp.lt.s32.totalorder %s1921_s17, %s2966_s3 }
 0x32e   : > { %1220 = vmatpush.msrb.mxu1 %v1796_v63  ;;  %1240 = vmatpush.msrb.mxu2 %v1797_v19  ;;  %p1923_p4 = scmp.ne.s32.totalorder %s1921_s17, %s1922_s25  ;;  %p1928_p8 = scmp.lt.s32.totalorder %s1926_s24, %s1922_s25 }
 0x32f   : > { %1143 = vmatpush.msrb.mxu0 %v2807_v59 }
 0x330   : > { %1221 = vmatpush.msrb.mxu1 %v1799_v22  ;;  %1241 = vmatpush.msrb.mxu2 %v1800_v49  ;;  %p1924_p5 = pnand %p1923_p4, %p2074_p9  ;;  %p1929_p10 = por %p1928_p8, %p1927_p7 }
 0x331   : > { %1144 = vmatpush.msrb.mxu0 %v2813_v25 }
 0x332   : > { %1222 = vmatpush.msrb.mxu1 %v1802_v48  ;;  %1242 = vmatpush.msrb.mxu2 %v1803_v23  ;;  %p1925_p6 = pneg %p1924_p5 }
 0x333   : > { %1145 = vmatpush.msrb.mxu0 %v2819_v24 }
 0x334   : > { %1223 = vmatpush.msrb.mxu1 %v1805_v26  ;;  %1243 = vmatpush.msrb.mxu2 %v1806_v27  ;;  %p1930_p13 = pnand %p1929_p10, %p1925_p6 }
 0x335   : > { %1146 = vmatpush.msrb.mxu0 %v2825_v28 }
 0x336   : > { %1224 = vmatpush.msrb.mxu1 %v1808_v29  ;;  %1244 = vmatpush.msrb.mxu2 %v1809_v30 }
 0x337   : > { %1147 = vmatpush.msrb.mxu0 %v2831_v31 }
 0x338   : > { %1225 = vmatpush.msrb.mxu1 %v1811_v32  ;;  %1245 = vmatpush.msrb.mxu2 %v1812_v33 }
 0x339   : > { %1148 = vmatpush.msrb.mxu0 %v2837_v34 }
 0x33a   : > { %1226 = vmatpush.msrb.mxu1 %v1814_v35  ;;  %1246 = vmatpush.msrb.mxu2 %v1815_v36 }
 0x397   : > { %v874_v40 = vpop.f32.mrf.mxu0  ;;  %v894_v45 = vpop.f32.mrf.mxu1 }
 0x398   : > { %v875_v46 = vadd.f32 %v874_v40, %v3028_v10  ;;  %v895_v0 = vadd.f32 %v894_v45, %v3029_v14 }
 0x39a   : > { %v917_v1 = vadd.f32 %v875_v46, %v854_v37  ;;  %v937_v2 = vadd.f32 %v895_v0, %v855_v43 }
 0x39c   : > { %v1567_v3 = vmul.f32 -1.442695, %v917_v1  ;;  %v1568_v4 = vmul.f32 -1.442695, %v937_v2 }
 0x39e   : > { %1728 = vpow2.f32 %v1567_v3  ;;  %v914_v51 = vpop.f32.mrf.mxu2 }
 0x39f   : > { %1730 = vpow2.f32 %v1568_v4  ;;  %v915_v54 = vadd.f32 %v914_v51, %v2479_v47 }
 0x3a4   : > { %v1729_v5 = vpop.eup %1728 }
 0x3a5   : > { %v1731_v55 = vpop.eup %1730  ;;  %v921_v44 = vadd.f32 1.0, %v1729_v5 }
 0x3a6   : > { %v941_v41 = vadd.f32 1.0, %v1731_v55 }
 0x3a7   : > { %1732 = vrcp.f32 %v921_v44  ;;  %v933_v17 = vand.u32 2147483648, %v921_v44  ;;  %v931_v58 = vand.u32 2147483647, %v921_v44  ;;  %vm927_vm1 = vweird.f32 %v921_v44 }
 0x3a8   : > { %1734 = vrcp.f32 %v941_v41  ;;  %v953_v22 = vand.u32 2147483648, %v941_v41  ;;  %vm947_vm5 = vweird.f32 %v941_v41  ;;  %v951_v48 = vand.u32 2147483647, %v941_v41 }
 0x3a9   : > { %v934_v52 = vor.u32 1.1754944e-38, %v933_v17  ;;  %vm932_vm3 = vcmp.eq.f32.partialorder %v931_v58, 8.507059e+37 }
 0x3aa   : > { %v954_v27 = vor.u32 1.1754944e-38, %v953_v22  ;;  %vm952_vm7 = vcmp.eq.f32.partialorder %v951_v48, 8.507059e+37 }
 0x3ad   : > { %v1733_v6 = vpop.eup %1732 }
 0x3ae   : > { %v1735_v7 = vpop.eup %1734  ;;  %v923_v8 = vmul.f32 %v1733_v6, %v921_v44  ;;  %vm928_vm0 = vweird.f32 %v1733_v6  ;;  %v1573_v44 = vld [vmem:[%s2882_s27 + $0x88] sm:$0xff] }
 0x3af   : > { %v943_v9 = vmul.f32 %v1735_v7, %v941_v41  ;;  %vm929_vm2 = vmor %vm927_vm1, %vm928_vm0  ;;  %vm948_vm4 = vweird.f32 %v1735_v7 }
 0x3b0   : > { %v924_v11 = vsub.f32 1.0, %v923_v8  ;;  %vm949_vm6 = vmor %vm947_vm5, %vm948_vm4 }
 0x3b1   : > { %v944_v15 = vsub.f32 1.0, %v943_v9 }
 0x3b2   : > { %v925_v18 = vmul.f32 %v1733_v6, %v924_v11 }
 0x3b3   : > { %v945_v42 = vmul.f32 %v1735_v7, %v944_v15 }
 0x3b4   : > { %v926_v38 = vadd.f32 %v1733_v6, %v925_v18 }
 0x3b5   : > { %v946_v19 = vadd.f32 %v1735_v7, %v945_v42 }
 0x3b6   : > { %v930_v13 = vsel %vm929_vm2, %v1733_v6, %v926_v38 }
 0x3b7   : > { %v935_v63 = vsel %vm932_vm3, %v934_v52, %v930_v13  ;;  %v950_v26 = vsel %vm949_vm6, %v1735_v7, %v946_v19 }
 0x3b8   : > { %v957_v49 = vmul.f32 %v935_v63, %v915_v54  ;;  %v955_v29 = vsel %vm952_vm7, %v954_v27, %v950_v26  ;;  %v1579_v54 = vld [vmem:[%s2895_s23 + $0x90] sm:$0xff] }
 0x3b9   : > { %v961_v30 = vsub.f32 1.0, %v955_v29  ;;  %v960_v35 = vmul.f32 %v955_v29, %v2740_v56  ;;  %v1572_v56 = vld [vmem:[%s2882_s27 + $0x80] sm:$0xff] }
 0x3ba   : > { %v958_v23 = vadd.f32 %v957_v49, %v856_v61  ;;  %v1580_v61 = vld [vmem:[%s2895_s23 + $0x98] sm:$0xff] }
 0x3bc   : > { %1736 = vtanh.f32 %v958_v23 }
 0x3c2   : > { %v1737_v32 = vpop.eup %1736 }
 0x3c3   : > { %v962_v33 = vmul.f32 %v1737_v32, %v961_v30 }
 0x3c5   : > { %v2858_v36 = vadd.f32 %v962_v33, %v960_v35 }
 0x3c7   : > { %966 = vst [vmem:[%s965_s18] sm:$0xff] %v2858_v36  ;;  %991 = vmatmul.f32.vlgmr.msrb.gmra.mxu3 %v2858_v36  ;;  %1011 = vmatmul.f32.vlgmr.msra.gmra.mxu0 %v2858_v36 }
 0x3c8   : > { %1031 = vmatmul.f32.vlgmr.msra.gmra.mxu1 %v2858_v36  ;;  %1251 = vmatpush.msrb.mxu3 %v2747_v20 }
 0x3ca   : > { %1252 = vmatpush.msrb.mxu3 %v2753_v57 }
 0x3cc   : > { %1253 = vmatpush.msrb.mxu3 %v2759_v21 }
 0x3ce   : > { %1254 = vmatpush.msrb.mxu3 %v2765_v53 }
 0x3d0   : > { %1255 = vmatpush.msrb.mxu3 %v2771_v60  ;;  %v1571_v60 = vld [vmem:[%s2882_s27 + $0x78] sm:$0xff] }
 0x3d2   : > { %1256 = vmatpush.msrb.mxu3 %v2777_v50 }
 0x3d4   : > { %1257 = vmatpush.msrb.mxu3 %v2783_v62 }
 0x3d6   : > { %1258 = vmatpush.msrb.mxu3 %v2789_v12 }
 0x3d8   : > { %1259 = vmatpush.msrb.mxu3 %v2795_v39 }
 0x3da   : > { %1260 = vmatpush.msrb.mxu3 %v2801_v16 }
 0x3dc   : > { %1261 = vmatpush.msrb.mxu3 %v2807_v59 }
 0x3de   : > { %1262 = vmatpush.msrb.mxu3 %v2813_v25 }
 0x3e0   : > { %1263 = vmatpush.msrb.mxu3 %v2819_v24 }
 0x3e2   : > { %1264 = vmatpush.msrb.mxu3 %v2825_v28 }
 0x3e4   : > { %1265 = vmatpush.msrb.mxu3 %v2831_v31 }
 0x3e6   : > { %1266 = vmatpush.msrb.mxu3 %v2837_v34 }
 0x444   : > { %v1012_v20 = vpop.f32.mrf.mxu0 }
 0x445   : > { %v1013_v57 = vadd.f32 %v1012_v20, %v3029_v14  ;;  %v1032_v2 = vpop.f32.mrf.mxu1 }
 0x446   : > { %v1033_v5 = vadd.f32 %v1032_v2, %v2479_v47 }
 0x447   : > { %v1055_v21 = vadd.f32 %v1572_v56, %v1013_v57 }
 0x449   : > { %v1575_v53 = vmul.f32 -1.442695, %v1055_v21 }
 0x44a   : > { %v992_v50 = vpop.f32.mrf.mxu3 }
 0x44b   : > { %1738 = vpow2.f32 %v1575_v53  ;;  %v993_v62 = vadd.f32 %v992_v50, %v3028_v10 }
 0x44d   : > { %v1035_v12 = vadd.f32 %v1571_v60, %v993_v62 }
 0x44f   : > { %v1574_v39 = vmul.f32 -1.442695, %v1035_v12 }
 0x451   : > { %v1739_v16 = vpop.eup %1738  ;;  %1740 = vpow2.f32 %v1574_v39 }
 0x452   : > { %v1059_v59 = vadd.f32 1.0, %v1739_v16 }
 0x454   : > { %1742 = vrcp.f32 %v1059_v59  ;;  %v1071_v7 = vand.u32 2147483648, %v1059_v59  ;;  %vm1065_vm13 = vweird.f32 %v1059_v59  ;;  %v1069_v9 = vand.u32 2147483647, %v1059_v59 }
 0x456   : > { %v1072_v17 = vor.u32 1.1754944e-38, %v1071_v7  ;;  %vm1070_vm15 = vcmp.eq.f32.partialorder %v1069_v9, 8.507059e+37  ;;  %v1588_v7 = vld [vmem:[%s2913_s7 + $0xb0] sm:$0xff] }
 0x457   : > { %v1741_v25 = vpop.eup %1740 }
 0x458   : > { %v1039_v24 = vadd.f32 1.0, %v1741_v25  ;;  %v1581_v25 = vld [vmem:[%s2895_s23 + $0xa0] sm:$0xff] }
 0x45a   : > { %1744 = vrcp.f32 %v1039_v24  ;;  %v1743_v28 = vpop.eup %1742  ;;  %v1051_v45 = vand.u32 2147483648, %v1039_v24  ;;  %v1049_v0 = vand.u32 2147483647, %v1039_v24  ;;  %vm1045_vm9 = vweird.f32 %v1039_v24 }
 0x45b   : > { %v1061_v31 = vmul.f32 %v1743_v28, %v1059_v59  ;;  %vm1066_vm12 = vweird.f32 %v1743_v28 }
 0x45c   : > { %v1052_v4 = vor.u32 1.1754944e-38, %v1051_v45  ;;  %vm1050_vm11 = vcmp.eq.f32.partialorder %v1049_v0, 8.507059e+37  ;;  %vm1067_vm14 = vmor %vm1065_vm13, %vm1066_vm12 }
 0x45d   : > { %v1062_v40 = vsub.f32 1.0, %v1061_v31 }
 0x45f   : > { %v1063_v1 = vmul.f32 %v1743_v28, %v1062_v40 }
 0x460   : > { %v1745_v34 = vpop.eup %1744 }
 0x461   : > { %v1041_v37 = vmul.f32 %v1745_v34, %v1039_v24  ;;  %vm1046_vm8 = vweird.f32 %v1745_v34  ;;  %v1064_v6 = vadd.f32 %v1743_v28, %v1063_v1 }
 0x462   : > { %vm1047_vm10 = vmor %vm1045_vm9, %vm1046_vm8 }
 0x463   : > { %v1042_v43 = vsub.f32 1.0, %v1041_v37  ;;  %v1068_v15 = vsel %vm1067_vm14, %v1743_v28, %v1064_v6 }
 0x464   : > { %v1073_v18 = vsel %vm1070_vm15, %v1072_v17, %v1068_v15 }
 0x465   : > { %v1043_v46 = vmul.f32 %v1745_v34, %v1042_v43  ;;  %v1079_v58 = vsub.f32 1.0, %v1073_v18  ;;  %v1078_v51 = vmul.f32 %v1073_v18, %v2858_v36 }
 0x467   : > { %v1044_v3 = vadd.f32 %v1745_v34, %v1043_v46 }
 0x469   : > { %v1048_v55 = vsel %vm1047_vm10, %v1745_v34, %v1044_v3 }
 0x46a   : > { %v1053_v41 = vsel %vm1050_vm11, %v1052_v4, %v1048_v55 }
 0x46b   : > { %v1075_v8 = vmul.f32 %v1053_v41, %v1033_v5  ;;  %v1587_v5 = vld [vmem:[%s2913_s7 + $0xa8] sm:$0xff] }
 0x46d   : > { %v1076_v11 = vadd.f32 %v1573_v44, %v1075_v8 }
 0x46f   : > { %1746 = vtanh.f32 %v1076_v11 }
 0x475   : > { %v1747_v42 = vpop.eup %1746 }
 0x476   : > { %v1080_v38 = vmul.f32 %v1747_v42, %v1079_v58 }
 0x478   : > { %v1081_v52 = vadd.f32 %v1080_v38, %v1078_v51 }
 0x47a   : > { %1577 = vst [vmem:[%s1450_s19 + $0x28] sm:$0xff] %v1081_v52  ;;  %1109 = vmatmul.f32.vlgmr.msra.gmra.mxu2 %v1081_v52  ;;  %1129 = vmatmul.f32.vlgmr.msra.gmra.mxu3 %v1081_v52 }
 0x47b   : > { %1149 = vmatmul.f32.vlgmr.msrb.gmra.mxu0 %v1081_v52 }
 0x4f8   : > { %v1150_v50 = vpop.f32.mrf.mxu0 }
 0x4f9   : > { %v1151_v16 = vadd.f32 %v1150_v50, %v2479_v47 }
 0x4fd   : > { %v1110_v13 = vpop.f32.mrf.mxu2  ;;  %v1130_v63 = vpop.f32.mrf.mxu3 }
 0x4fe   : > { %v1111_v19 = vadd.f32 %v1110_v13, %v3028_v10  ;;  %v1131_v22 = vadd.f32 %v1130_v63, %v3029_v14 }
 0x500   : > { %v1153_v49 = vadd.f32 %v1579_v54, %v1111_v19  ;;  %v1173_v48 = vadd.f32 %v1580_v61, %v1131_v22 }
 0x502   : > { %v1582_v23 = vmul.f32 -1.442695, %v1153_v49  ;;  %v1583_v26 = vmul.f32 -1.442695, %v1173_v48 }
 0x504   : > { %1748 = vpow2.f32 %v1582_v23 }
 0x505   : > { %1750 = vpow2.f32 %v1583_v26  ;;  %v1589_v26 = vld [vmem:[%s2913_s7 + $0xb8] sm:$0xff] }
 0x50a   : > { %v1749_v27 = vpop.eup %1748 }
 0x50b   : > { %v1751_v29 = vpop.eup %1750  ;;  %v1157_v30 = vadd.f32 1.0, %v1749_v27 }
 0x50c   : > { %v1177_v32 = vadd.f32 1.0, %v1751_v29 }
 0x50d   : > { %1752 = vrcp.f32 %v1157_v30  ;;  %v1169_v57 = vand.u32 2147483648, %v1157_v30  ;;  %v1167_v60 = vand.u32 2147483647, %v1157_v30  ;;  %vm1163_vm1 = vweird.f32 %v1157_v30 }
 0x50e   : > { %1754 = vrcp.f32 %v1177_v32  ;;  %v1189_v34 = vand.u32 2147483648, %v1177_v32  ;;  %vm1183_vm5 = vweird.f32 %v1177_v32  ;;  %v1187_v37 = vand.u32 2147483647, %v1177_v32 }
 0x50f   : > { %v1170_v39 = vor.u32 1.1754944e-38, %v1169_v57  ;;  %vm1168_vm3 = vcmp.eq.f32.partialorder %v1167_v60, 8.507059e+37 }
 0x510   : > { %v1190_v45 = vor.u32 1.1754944e-38, %v1189_v34  ;;  %vm1188_vm7 = vcmp.eq.f32.partialorder %v1187_v37, 8.507059e+37 }
 0x513   : > { %v1753_v33 = vpop.eup %1752 }
 0x514   : > { %v1755_v35 = vpop.eup %1754  ;;  %v1159_v36 = vmul.f32 %v1753_v33, %v1157_v30  ;;  %vm1164_vm0 = vweird.f32 %v1753_v33 }
 0x515   : > { %v1179_v56 = vmul.f32 %v1755_v35, %v1177_v32  ;;  %vm1165_vm2 = vmor %vm1163_vm1, %vm1164_vm0  ;;  %vm1184_vm4 = vweird.f32 %v1755_v35 }
 0x516   : > { %v1160_v20 = vsub.f32 1.0, %v1159_v36  ;;  %vm1185_vm6 = vmor %vm1183_vm5, %vm1184_vm4 }
 0x517   : > { %v1180_v21 = vsub.f32 1.0, %v1179_v56 }
 0x518   : > { %v1161_v53 = vmul.f32 %v1753_v33, %v1160_v20 }
 0x519   : > { %v1181_v62 = vmul.f32 %v1755_v35, %v1180_v21 }
 0x51a   : > { %v1162_v12 = vadd.f32 %v1753_v33, %v1161_v53 }
 0x51b   : > { %v1182_v28 = vadd.f32 %v1755_v35, %v1181_v62 }
 0x51c   : > { %v1166_v59 = vsel %vm1165_vm2, %v1753_v33, %v1162_v12 }
 0x51d   : > { %v1171_v24 = vsel %vm1168_vm3, %v1170_v39, %v1166_v59  ;;  %v1186_v43 = vsel %vm1185_vm6, %v1755_v35, %v1182_v28 }
 0x51e   : > { %v1193_v31 = vmul.f32 %v1171_v24, %v1151_v16  ;;  %v1191_v46 = vsel %vm1188_vm7, %v1190_v45, %v1186_v43 }
 0x51f   : > { %v1197_v0 = vsub.f32 1.0, %v1191_v46  ;;  %v1196_v2 = vmul.f32 %v1191_v46, %v1081_v52 }
 0x520   : > { %v1194_v40 = vadd.f32 %v1581_v25, %v1193_v31 }
 0x522   : > { %1756 = vtanh.f32 %v1194_v40 }
 0x528   : > { %v1757_v1 = vpop.eup %1756 }
 0x529   : > { %v1198_v3 = vmul.f32 %v1757_v1, %v1197_v0 }
 0x52b   : > { %v2905_v4 = vadd.f32 %v1198_v3, %v1196_v2 }
 0x52d   : > { %1227 = vmatmul.f32.vlgmr.msrb.gmra.mxu1 %v2905_v4  ;;  %1585 = vst [vmem:[%s1458_s5 + $0x30] sm:$0xff] %v2905_v4  ;;  %1247 = vmatmul.f32.vlgmr.msrb.gmra.mxu2 %v2905_v4 }
 0x52e   : > { %1267 = vmatmul.f32.vlgmr.msrb.gmra.mxu3 %v2905_v4 }
 0x5aa   : > { %v1228_v55 = vpop.f32.mrf.mxu1 }
 0x5ab   : > { %v1229_v44 = vadd.f32 %v1228_v55, %v3028_v10 }
 0x5ad   : > { %v1271_v41 = vadd.f32 %v1587_v5, %v1229_v44 }
 0x5af   : > { %v1590_v6 = vmul.f32 -1.442695, %v1271_v41 }
 0x5b0   : > { %v1248_v8 = vpop.f32.mrf.mxu2 }
 0x5b1   : > { %1758 = vpow2.f32 %v1590_v6  ;;  %v1249_v9 = vadd.f32 %v1248_v8, %v3029_v14  ;;  %v1268_v63 = vpop.f32.mrf.mxu3 }
 0x5b2   : > { %v1269_v48 = vadd.f32 %v1268_v63, %v2479_v47 }
 0x5b3   : > { %v1291_v11 = vadd.f32 %v1588_v7, %v1249_v9 }
 0x5b5   : > { %v1591_v15 = vmul.f32 -1.442695, %v1291_v11 }
 0x5b7   : > { %v1759_v17 = vpop.eup %1758  ;;  %1760 = vpow2.f32 %v1591_v15 }
 0x5b8   : > { %v1275_v18 = vadd.f32 1.0, %v1759_v17 }
 0x5ba   : > { %1762 = vrcp.f32 %v1275_v18  ;;  %v1287_v10 = vand.u32 2147483648, %v1275_v18  ;;  %v1285_v13 = vand.u32 2147483647, %v1275_v18  ;;  %vm1281_vm9 = vweird.f32 %v1275_v18 }
 0x5bc   : > { %v1288_v22 = vor.u32 1.1754944e-38, %v1287_v10  ;;  %vm1286_vm11 = vcmp.eq.f32.partialorder %v1285_v13, 8.507059e+37 }
 0x5bd   : > { %v1761_v58 = vpop.eup %1760 }
 0x5be   : > { %v1295_v42 = vadd.f32 1.0, %v1761_v58 }
 0x5c0   : > { %v1763_v51 = vpop.eup %1762  ;;  %1764 = vrcp.f32 %v1295_v42  ;;  %v1307_v30 = vand.u32 2147483648, %v1295_v42  ;;  %v1305_v33 = vand.u32 2147483647, %v1295_v42  ;;  %vm1301_vm13 = vweird.f32 %v1295_v42 }
 0x5c1   : > { %v1277_v38 = vmul.f32 %v1763_v51, %v1275_v18  ;;  %vm1282_vm8 = vweird.f32 %v1763_v51 }
 0x5c2   : > { %vm1283_vm10 = vmor %vm1281_vm9, %vm1282_vm8  ;;  %v1308_v56 = vor.u32 1.1754944e-38, %v1307_v30  ;;  %vm1306_vm15 = vcmp.eq.f32.partialorder %v1305_v33, 8.507059e+37 }
 0x5c3   : > { %v1278_v52 = vsub.f32 1.0, %v1277_v38 }
 0x5c5   : > { %v1279_v54 = vmul.f32 %v1763_v51, %v1278_v52 }
 0x5c6   : > { %v1765_v61 = vpop.eup %1764 }
 0x5c7   : > { %v1297_v14 = vmul.f32 %v1765_v61, %v1295_v42  ;;  %v1280_v19 = vadd.f32 %v1763_v51, %v1279_v54  ;;  %vm1302_vm12 = vweird.f32 %v1765_v61 }
 0x5c8   : > { %vm1303_vm14 = vmor %vm1301_vm13, %vm1302_vm12 }
 0x5c9   : > { %v1298_v49 = vsub.f32 1.0, %v1297_v14  ;;  %v1284_v23 = vsel %vm1283_vm10, %v1763_v51, %v1280_v19 }
 0x5ca   : > { %v1289_v27 = vsel %vm1286_vm11, %v1288_v22, %v1284_v23 }
 0x5cb   : > { %v1299_v29 = vmul.f32 %v1765_v61, %v1298_v49  ;;  %v1311_v32 = vmul.f32 %v1289_v27, %v1269_v48 }
 0x5cd   : > { %v1300_v35 = vadd.f32 %v1765_v61, %v1299_v29  ;;  %v1312_v36 = vadd.f32 %v1589_v26, %v1311_v32 }
 0x5cf   : > { %v1304_v20 = vsel %vm1303_vm14, %v1765_v61, %v1300_v35  ;;  %1766 = vtanh.f32 %v1312_v36 }
 0x5d0   : > { %v1309_v47 = vsel %vm1306_vm15, %v1308_v56, %v1304_v20 }
 0x5d1   : > { %v1315_v57 = vsub.f32 1.0, %v1309_v47  ;;  %v1314_v53 = vmul.f32 %v1309_v47, %v2905_v4 }
 0x5d5   : > { %v1767_v21 = vpop.eup %1766 }
 0x5d6   : > { %v1316_v60 = vmul.f32 %v1767_v21, %v1315_v57 }
 0x5d8   : > { %v1317_v50 = vadd.f32 %v1316_v60, %v1314_v53 }
 0x5da   : > { %1593 = vst [vmem:[%s1466_s12 + $0x38] sm:$0xff] %v1317_v50 }
 0x5db   : > { %1933 = shalt.err (!%p1930_p13)
}
 0x5dc   : > { %s1997_s1 = smov 128   ;;  %s1998_s29 = smov 8  }
 0x5dd   : > { %1617 = dma.vmem_to_hbm [thread:$0]  (%p2074_p9), %s1342_s20, 1024, %s1344_s26, %s1323_s14, %s1997_s1, %s1997_s1, %s1998_s29  }
 0x5de PF: > { %s3031_s19 = sld [smem:[#allocation13_spill]]  ;;  %p1630_p0 = pnand %p1533_p12, %p2081_p11 }
 0x5df   : > { %s3033_s23 = sld [smem:[#allocation15_spill]] }
 0x5e0   : > { %p1631_p1 = pneg %p1630_p0 }
 0x5e4   : > { %s1358_s6 = sand.u32 1, %s3031_s19  }
 0x5e5   : > { %s1359_s5 = scalar_lea.sflag [#allocation5], %s1358_s6 }
 0x5e6   : > { %1967 = dma.done.wait (%p1631_p1), %s1359_s5, 1024  }
 0x5e7   : > { %1969 = vsyncadd (%p1631_p1), %s1359_s5, 4294966272  ;;  %s22_s17 = sadd.s32 1, %s3033_s23   ;;  %s3034_s4 = sld [smem:[#allocation14_spill]] }
 0x5e8   : > { %p19_p2 = scmp.ge.s32.totalorder %s22_s17, 4   ;;  %s3035_s14 = sld [smem:[#allocation18_spill]] }
 0x5e9   : > { %s3036_s7 = sld [smem:[#allocation16_spill]]  ;;  %s3037_s12 = smov %s1976_s13 }
 0x5ea   : > { %s3039_s15 = smov %s1988_s16 }
 0x5eb   :  { %21 = sbr.rel (!%p19_p2) target bundleno = 10 (0xa), region = 121 }
 0x5ed   : > { %s3038_s13 = smov %s3034_s4 }
 0x5ef   : > { %s3040_s16 = smov %s3036_s7 }
 0x5f0   :  { %1365 = vsyncpa [#allocation4], 1 }
 0x5f1   :  { %1367 = vsyncpa [#allocation4 + $0x1], 1 }
 0x5f2   :  { %1368 = vsyncpa [#allocation7], 1 }
 0x5f3   :  { %1370 = vsyncpa [#allocation7 + $0x1], 1 }
 0x5f4   :  { %1371 = vsyncpa [#allocation5], 1 }
 0x5f5   :  { %1373 = vsyncpa [#allocation5 + $0x1], 1 }

</bundles_post_ra>
